<compile_context>
chip_gen: v6e
topology: v6e:2x2x1
jax: 0.10.0
libtpu: 0.0.40
codegen_flags: <defaults>
</compile_context>

<pallas_src>
import functools

import numpy as np

import jax
import jax.numpy as jnp
from jax.experimental import pallas as pl
from jax.experimental.pallas import tpu as pltpu

EPS = 1e-5  # nn.BatchNorm2d default eps


# ------------------------------ in-kernel helpers ---------------------------------
def _store_padded(xp_ref, act, H, W, C):
    """Write act (H, W*C) into the zero-padded slab xp (H+2, (W+2)*C).

    Only the four thin border strips are zeroed (not the whole buffer); the interior
    store is the only activation-sized store of the stage.
    """
    xp_ref[0:1, :] = jnp.zeros((1, (W + 2) * C), jnp.float32)
    xp_ref[H + 1:H + 2, :] = jnp.zeros((1, (W + 2) * C), jnp.float32)
    xp_ref[:, 0:C] = jnp.zeros((H + 2, C), jnp.float32)
    xp_ref[:, (W + 1) * C:] = jnp.zeros((H + 2, C), jnp.float32)
    xp_ref[1:H + 1, C:(W + 1) * C] = act


def _banded_conv3x3(xp_ref, w_ref, y_ref, st_ref, H, W, C, wt):
    """3x3 stride-1 conv from the padded slab + per-lane batch-stat partials.

    Per width tile: one bf16 downcast of the shared (H+2, (wt+2)*C) window, then
    three MXU dots (one per ky tap) against the banded weight w_ref[k] of shape
    ((wt+2)*C, wt*C); the kx taps + input channels are folded into the band, so
    every dot has a healthy contraction size instead of K = Cin.
    """
    kb = (wt + 2) * C
    w0, w1, w2 = w_ref[0], w_ref[1], w_ref[2]
    for t in range(W // wt):                       # static loop over width tiles
        lo = t * wt * C
        win = xp_ref[:, lo:lo + kb].astype(jnp.bfloat16)          # (H+2, kb) bf16
        acc = jnp.dot(win[0:H], w0, preferred_element_type=jnp.float32)
        acc = acc + jnp.dot(win[1:H + 1], w1, preferred_element_type=jnp.float32)
        acc = acc + jnp.dot(win[2:H + 2], w2, preferred_element_type=jnp.float32)
        y_ref[0, :, lo:lo + wt * C] = acc                          # raw conv out (f32)
        st_ref[0, 0:1, lo:lo + wt * C] = jnp.sum(acc, axis=0, keepdims=True)
        st_ref[0, 1:2, lo:lo + wt * C] = jnp.sum(acc * acc, axis=0, keepdims=True)


def _conv_stats_kernel(x_ref, w_ref, y_ref, st_ref, xp_ref, *, H, W, C, wt):
    """Pass 1: conv1(x) -> raw output + per-lane sum / sumsq partials."""
    _store_padded(xp_ref, x_ref[0], H, W, C)
    _banded_conv3x3(xp_ref, w_ref, y_ref, st_ref, H, W, C, wt)


def _bn_relu_conv_stats_kernel(y1_ref, s_ref, b_ref, w_ref, y2_ref, st_ref, xp_ref,
                               *, H, W, C, wt):
    """Pass 2: act1 = relu(bn1(y1)) as one FMA -> conv2(act1) + stat partials."""
    act = jnp.maximum(y1_ref[0] * s_ref[...] + b_ref[...], 0.0)
    _store_padded(xp_ref, act, H, W, C)
    _banded_conv3x3(xp_ref, w_ref, y2_ref, st_ref, H, W, C, wt)


def _bn_add_relu_kernel(y2_ref, x_ref, s_ref, b_ref, o_ref):
    """Pass 3: out = relu(bn2(y2) + identity)."""
    o_ref[0] = jnp.maximum(y2_ref[0] * s_ref[...] + b_ref[...] + x_ref[0], 0.0)


# ------------------------------ pallas_call wrappers -------------------------------
def _parallel_params():
    # Batch axis is independent work -> "parallel" (v7x megacore split); pipelining
    # (default 2-deep double buffering) overlaps the per-image DMA with the MXU dots.
    return pltpu.CompilerParams(dimension_semantics=("parallel",))


def _conv_stats_call(x_slab, wb, N, H, W, C, wt):
    kernel = functools.partial(_conv_stats_kernel, H=H, W=W, C=C, wt=wt)
    return pl.pallas_call(
        kernel,
        grid=(N,),
        in_specs=[
            pl.BlockSpec((1, H, W * C), lambda i: (i, 0, 0)),                 # x
            pl.BlockSpec((3, (wt + 2) * C, wt * C), lambda i: (0, 0, 0)),     # weight (resident)
        ],
        out_specs=[
            pl.BlockSpec((1, H, W * C), lambda i: (i, 0, 0)),                 # raw conv out
            pl.BlockSpec((1, 2, W * C), lambda i: (i, 0, 0)),                 # stat partials
        ],
        out_shape=[
            jax.ShapeDtypeStruct((N, H, W * C), jnp.float32),
            jax.ShapeDtypeStruct((N, 2, W * C), jnp.float32),
        ],
        scratch_shapes=[pltpu.VMEM((H + 2, (W + 2) * C), jnp.float32)],
        compiler_params=_parallel_params(),
    )(x_slab, wb)


def _bn_relu_conv_stats_call(y1, scale_lane, bias_lane, wb, N, H, W, C, wt):
    kernel = functools.partial(_bn_relu_conv_stats_kernel, H=H, W=W, C=C, wt=wt)
    return pl.pallas_call(
        kernel,
        grid=(N,),
        in_specs=[
            pl.BlockSpec((1, H, W * C), lambda i: (i, 0, 0)),                 # conv1 raw
            pl.BlockSpec((1, W * C), lambda i: (0, 0)),                       # bn1 scale
            pl.BlockSpec((1, W * C), lambda i: (0, 0)),                       # bn1 bias
            pl.BlockSpec((3, (wt + 2) * C, wt * C), lambda i: (0, 0, 0)),     # weight (resident)
        ],
        out_specs=[
            pl.BlockSpec((1, H, W * C), lambda i: (i, 0, 0)),
            pl.BlockSpec((1, 2, W * C), lambda i: (i, 0, 0)),
        ],
        out_shape=[
            jax.ShapeDtypeStruct((N, H, W * C), jnp.float32),
            jax.ShapeDtypeStruct((N, 2, W * C), jnp.float32),
        ],
        scratch_shapes=[pltpu.VMEM((H + 2, (W + 2) * C), jnp.float32)],
        compiler_params=_parallel_params(),
    )(y1, scale_lane, bias_lane, wb)


def _bn_add_relu_call(y2, x_slab, scale_lane, bias_lane, N, H, W, C):
    return pl.pallas_call(
        _bn_add_relu_kernel,
        grid=(N,),
        in_specs=[
            pl.BlockSpec((1, H, W * C), lambda i: (i, 0, 0)),                 # conv2 raw
            pl.BlockSpec((1, H, W * C), lambda i: (i, 0, 0)),                 # identity
            pl.BlockSpec((1, W * C), lambda i: (0, 0)),                       # bn2 scale
            pl.BlockSpec((1, W * C), lambda i: (0, 0)),                       # bn2 bias
        ],
        out_specs=pl.BlockSpec((1, H, W * C), lambda i: (i, 0, 0)),
        out_shape=jax.ShapeDtypeStruct((N, H, W * C), jnp.float32),
        compiler_params=_parallel_params(),
    )(y2, x_slab, scale_lane, bias_lane)


# --------------------------------- forward pass ------------------------------------
def _fold_bn(st_lane, gamma, beta, N, H, W, C):
    """Tiny wrapper-side reduction: per-image per-lane partials -> per-channel
    batch stats -> lane-broadcast (1, W*C) scale/bias consumed as one FMA."""
    s = st_lane.reshape(N, 2, W, C).sum(axis=(0, 2))          # (2, C)
    cnt = jnp.float32(N * H * W)
    mean = s[0] / cnt
    var = s[1] / cnt - mean * mean         # biased var (what BN normalizes with)
    scale = gamma * jax.lax.rsqrt(var + EPS)
    bias = beta - mean * scale
    return (jnp.tile(scale, W).reshape(1, W * C),
            jnp.tile(bias, W).reshape(1, W * C))


def basic_block_apply(x_nhwc, wb1, wb2, gamma1, beta1, gamma2, beta2, *, wt):
    """BasicBlock.forward (stride=1, downsample=None, train-mode BN batch stats).

    NHWC in / NHWC out.  Banded weights come from build_banded_weights (host-side,
    once per parameter update).  jit with static_argnames=("wt",).
    """
    N, H, W, C = x_nhwc.shape
    assert W % wt == 0
    x_slab = x_nhwc.reshape(N, H, W * C).astype(jnp.float32)

    # pass 1: conv1 + batch-stat partials
    y1, st1 = _conv_stats_call(x_slab, wb1, N, H, W, C, wt)
    s1, b1 = _fold_bn(st1, gamma1.astype(jnp.float32), beta1.astype(jnp.float32),
                      N, H, W, C)
    # pass 2: bn1 + relu + conv2 + batch-stat partials
    y2, st2 = _bn_relu_conv_stats_call(y1, s1, b1, wb2, N, H, W, C, wt)
    s2, b2 = _fold_bn(st2, gamma2.astype(jnp.float32), beta2.astype(jnp.float32),
                      N, H, W, C)
    # pass 3: bn2 + identity + relu
    out = _bn_add_relu_call(y2, x_slab, s2, b2, N, H, W, C)
    return out.reshape(N, H, W, C)


# ------------------------- host-side, once-per-update prep -------------------------
def build_banded_weights(w_oihw, wt):
    """Fold kx taps + input channels of a 3x3 stride-1 conv into per-ky banded
    weights Wb[ky, (p+kx)*Cin + ci, p*Cout + co] = w[co, ci, ky, kx], shape
    (3, (wt+2)*Cin, wt*Cout), bf16.  Call OUTSIDE jit, once per parameter update;
    the same band serves every width tile."""
    w = np.asarray(jax.device_get(w_oihw), dtype=np.float32)   # (Cout, Cin, 3, 3)
    cout, cin, kh, kw = w.shape
    assert (kh, kw) == (3, 3)
    wb = np.zeros((3, (wt + 2) * cin, wt * cout), np.float32)
    for ky in range(3):
        for kx in range(3):
            blk = w[:, :, ky, kx].T                            # (Cin, Cout)
            for p in range(wt):
                wb[ky, (p + kx) * cin:(p + kx + 1) * cin,
                   p * cout:(p + 1) * cout] = blk
    return jnp.asarray(wb, dtype=jnp.bfloat16)


def pick_width_tile(W, C, target_lanes=256):
    """wt*C ~ target_lanes (256 for v6e/v7x MXU width, 128 for v5e), W % wt == 0."""
    wt = max(1, min(W, target_lanes // max(C, 1)))
    while W % wt:
        wt -= 1
    return wt


# ----------------------- pure-JAX reference (for checking) -------------------------
def _ref_conv_bn(x, w, gamma, beta):
    y = jax.lax.conv_general_dilated(
        x, w, window_strides=(1, 1), padding=((1, 1), (1, 1)),
        dimension_numbers=("NCHW", "OIHW", "NCHW"),
        precision=jax.lax.Precision.HIGHEST)
    mean = jnp.mean(y, axis=(0, 2, 3), keepdims=True)
    var = jnp.mean((y - mean) ** 2, axis=(0, 2, 3), keepdims=True)
    return ((y - mean) * jax.lax.rsqrt(var + EPS) * gamma.reshape(1, -1, 1, 1)
            + beta.reshape(1, -1, 1, 1))


def _ref_basic_block(x, p):
    out = jnp.maximum(_ref_conv_bn(x, p["w1"], p["gamma1"], p["beta1"]), 0.0)
    out = _ref_conv_bn(out, p["w2"], p["gamma2"], p["beta2"])
    return jnp.maximum(out + x, 0.0)


if __name__ == "__main__":
    # Small shapes consistent with BasicBlock(in_channels=4, out_channels=4).
    N, C, H, W = 2, 4, 16, 16

    key = jax.random.PRNGKey(0)
    kxx, kw1, kw2, kg1, kb1, kg2, kb2 = jax.random.split(key, 7)

    x_nchw = jax.random.normal(kxx, (N, C, H, W), jnp.float32)       # NCHW (PyTorch layout)
    params = {
        "w1": 0.1 * jax.random.normal(kw1, (C, C, 3, 3), jnp.float32),
        "w2": 0.1 * jax.random.normal(kw2, (C, C, 3, 3), jnp.float32),
        "gamma1": 1.0 + 0.05 * jax.random.normal(kg1, (C,), jnp.float32),
        "beta1": 0.05 * jax.random.normal(kb1, (C,), jnp.float32),
        "gamma2": 1.0 + 0.05 * jax.random.normal(kg2, (C,), jnp.float32),
        "beta2": 0.05 * jax.random.normal(kb2, (C,), jnp.float32),
    }

    ref = _ref_basic_block(x_nchw, params)

    # NCHW <-> NHWC only at the test-harness edge (the kernel is NHWC end-to-end).
    x_nhwc = jnp.transpose(x_nchw, (0, 2, 3, 1))

    fwd = jax.jit(basic_block_apply, static_argnames=("wt",))
    # Exercise both the single-tile (wt = W) and the multi-width-tile (wt = 8) paths.
    for wt in sorted({pick_width_tile(W, C), 8}):
        wb1 = build_banded_weights(params["w1"], wt)
        wb2 = build_banded_weights(params["w2"], wt)
        out_nhwc = fwd(x_nhwc, wb1, wb2, params["gamma1"], params["beta1"],
                       params["gamma2"], params["beta2"], wt=wt)
        out_nhwc = jax.block_until_ready(out_nhwc)
        out = jnp.transpose(out_nhwc, (0, 3, 1, 2))
        assert out.shape == (N, C, H, W), out.shape
        max_err = float(jnp.max(jnp.abs(out - ref)))
        # bf16 MXU inputs (f32 accumulation) => small deviation vs the f32 reference.
        assert jnp.allclose(out, ref, rtol=5e-2, atol=5e-2), (wt, max_err)

    print("KERNEL_OK")
</pallas_src>

<mosaic_0001>
module attributes {stable_mosaic.version = 11 : i64} {
  func.func @_conv_stats_kernel(%arg0: i32, %arg1: memref<1x16x64xf32, #tpu.memory_space<vmem>>, %arg2: memref<3x40x32xbf16, #tpu.memory_space<vmem>>, %arg3: memref<1x16x64xf32, #tpu.memory_space<vmem>>, %arg4: memref<1x2x64xf32, #tpu.memory_space<vmem>>, %arg5: memref<18x72xf32, #tpu.memory_space<vmem>>) attributes {dimension_semantics = [#tpu.dimension_semantics<parallel>], iteration_bounds = array<i64: 2>, scalar_prefetch = 0 : i64, scratch_operands = 1 : i64, tpu.core_type = #tpu.core_type<tc>, window_params = [{transform_indices = @transform_0, window_bounds = array<i64: 1, 16, 64>}, {pipeline_mode = #tpu.pipeline_mode<synchronous>, transform_indices = @transform_1, window_bounds = array<i64: 3, 40, 32>}, {transform_indices = @transform_2, window_bounds = array<i64: 1, 16, 64>}, {transform_indices = @transform_3, window_bounds = array<i64: 1, 2, 64>}]} {
    %c0 = arith.constant 0 : index
    %c0_0 = arith.constant 0 : index
    %c0_1 = arith.constant 0 : index
    %0 = vector.load %arg1[%c0, %c0_0, %c0_1] : memref<1x16x64xf32, #tpu.memory_space<vmem>>, vector<1x16x64xf32>
    %1 = vector.shape_cast %0 : vector<1x16x64xf32> to vector<16x64xf32>
    %cst = arith.constant 0.000000e+00 : f32
    %2 = vector.broadcast %cst : f32 to vector<1x72xf32>
    %c0_2 = arith.constant 0 : index
    %c0_3 = arith.constant 0 : index
    %3 = vector.load %arg5[%c0_2, %c0_3] : memref<18x72xf32, #tpu.memory_space<vmem>>, vector<1x72xf32>
    tpu.vector_store %arg5[%c0_2, %c0_3], %2 {strides = array<i32>} : memref<18x72xf32, #tpu.memory_space<vmem>>, vector<1x72xf32>,
    %cst_4 = arith.constant 0.000000e+00 : f32
    %4 = vector.broadcast %cst_4 : f32 to vector<1x72xf32>
    %c17 = arith.constant 17 : index
    %c0_5 = arith.constant 0 : index
    %5 = vector.load %arg5[%c17, %c0_5] : memref<18x72xf32, #tpu.memory_space<vmem>>, vector<1x72xf32>
    tpu.vector_store %arg5[%c17, %c0_5], %4 {strides = array<i32>} : memref<18x72xf32, #tpu.memory_space<vmem>>, vector<1x72xf32>,
    %cst_6 = arith.constant 0.000000e+00 : f32
    %6 = vector.broadcast %cst_6 : f32 to vector<18x4xf32>
    %c0_7 = arith.constant 0 : index
    %c0_8 = arith.constant 0 : index
    %7 = vector.load %arg5[%c0_7, %c0_8] : memref<18x72xf32, #tpu.memory_space<vmem>>, vector<18x4xf32>
    tpu.vector_store %arg5[%c0_7, %c0_8], %6 {strides = array<i32>} : memref<18x72xf32, #tpu.memory_space<vmem>>, vector<18x4xf32>,
    %cst_9 = arith.constant 0.000000e+00 : f32
    %8 = vector.broadcast %cst_9 : f32 to vector<18x4xf32>
    %c0_10 = arith.constant 0 : index
    %c68 = arith.constant 68 : index
    %9 = vector.load %arg5[%c0_10, %c68] : memref<18x72xf32, #tpu.memory_space<vmem>>, vector<18x4xf32>
    tpu.vector_store %arg5[%c0_10, %c68], %8 {strides = array<i32>} : memref<18x72xf32, #tpu.memory_space<vmem>>, vector<18x4xf32>,
    %c1 = arith.constant 1 : index
    %c4 = arith.constant 4 : index
    %10 = vector.load %arg5[%c1, %c4] : memref<18x72xf32, #tpu.memory_space<vmem>>, vector<16x64xf32>
    tpu.vector_store %arg5[%c1, %c4], %1 {strides = array<i32>} : memref<18x72xf32, #tpu.memory_space<vmem>>, vector<16x64xf32>,
    %c0_11 = arith.constant 0 : index
    %c0_12 = arith.constant 0 : index
    %c0_13 = arith.constant 0 : index
    %11 = vector.load %arg2[%c0_11, %c0_12, %c0_13] : memref<3x40x32xbf16, #tpu.memory_space<vmem>>, vector<1x40x32xbf16>
    %12 = vector.shape_cast %11 : vector<1x40x32xbf16> to vector<40x32xbf16>
    %c1_14 = arith.constant 1 : index
    %c0_15 = arith.constant 0 : index
    %c0_16 = arith.constant 0 : index
    %13 = vector.load %arg2[%c1_14, %c0_15, %c0_16] : memref<3x40x32xbf16, #tpu.memory_space<vmem>>, vector<1x40x32xbf16>
    %14 = vector.shape_cast %13 : vector<1x40x32xbf16> to vector<40x32xbf16>
    %c2 = arith.constant 2 : index
    %c0_17 = arith.constant 0 : index
    %c0_18 = arith.constant 0 : index
    %15 = vector.load %arg2[%c2, %c0_17, %c0_18] : memref<3x40x32xbf16, #tpu.memory_space<vmem>>, vector<1x40x32xbf16>
    %16 = vector.shape_cast %15 : vector<1x40x32xbf16> to vector<40x32xbf16>
    %c0_19 = arith.constant 0 : index
    %c0_20 = arith.constant 0 : index
    %17 = vector.load %arg5[%c0_19, %c0_20] : memref<18x72xf32, #tpu.memory_space<vmem>>, vector<18x40xf32>
    %18 = arith.truncf %17 : vector<18x40xf32> to vector<18x40xbf16>
    %19 = vector.extract_strided_slice %18 {offsets = [0, 0], sizes = [16, 40], strides = [1, 1]} : vector<18x40xbf16> to vector<16x40xbf16>
    %cst_21 = arith.constant dense<0.000000e+00> : vector<16x32xf32>
    %20 = tpu.matmul %19, %12, %cst_21 {dimension_numbers = #tpu.dot_dimension_numbers<[1], [0], [0], [1], [0, 0, 1, 1], [], []>} : vector<16x40xbf16>, vector<40x32xbf16>, vector<16x32xf32> -> vector<16x32xf32>
    %21 = vector.extract_strided_slice %18 {offsets = [1, 0], sizes = [16, 40], strides = [1, 1]} : vector<18x40xbf16> to vector<16x40xbf16>
    %cst_22 = arith.constant dense<0.000000e+00> : vector<16x32xf32>
    %22 = tpu.matmul %21, %14, %cst_22 {dimension_numbers = #tpu.dot_dimension_numbers<[1], [0], [0], [1], [0, 0, 1, 1], [], []>} : vector<16x40xbf16>, vector<40x32xbf16>, vector<16x32xf32> -> vector<16x32xf32>
    %23 = arith.addf %20, %22 : vector<16x32xf32>
    %24 = vector.extract_strided_slice %18 {offsets = [2, 0], sizes = [16, 40], strides = [1, 1]} : vector<18x40xbf16> to vector<16x40xbf16>
    %cst_23 = arith.constant dense<0.000000e+00> : vector<16x32xf32>
    %25 = tpu.matmul %24, %16, %cst_23 {dimension_numbers = #tpu.dot_dimension_numbers<[1], [0], [0], [1], [0, 0, 1, 1], [], []>} : vector<16x40xbf16>, vector<40x32xbf16>, vector<16x32xf32> -> vector<16x32xf32>
    %26 = arith.addf %23, %25 : vector<16x32xf32>
    %c0_24 = arith.constant 0 : index
    %c0_25 = arith.constant 0 : index
    %c0_26 = arith.constant 0 : index
    %27 = vector.load %arg3[%c0_24, %c0_25, %c0_26] : memref<1x16x64xf32, #tpu.memory_space<vmem>>, vector<1x16x32xf32>
    %28 = vector.shape_cast %27 : vector<1x16x32xf32> to vector<16x32xf32>
    %29 = vector.shape_cast %26 : vector<16x32xf32> to vector<1x16x32xf32>
    tpu.vector_store %arg3[%c0_24, %c0_25, %c0_26], %29 {strides = array<i32>} : memref<1x16x64xf32, #tpu.memory_space<vmem>>, vector<1x16x32xf32>,
    %cst_27 = arith.constant dense<0.000000e+00> : vector<32xf32>
    %30 = vector.multi_reduction <add>, %26, %cst_27 [0] : vector<16x32xf32> to vector<32xf32>
    %31 = vector.shape_cast %30 : vector<32xf32> to vector<1x32xf32>
    %c0_28 = arith.constant 0 : index
    %c0_29 = arith.constant 0 : index
    %c0_30 = arith.constant 0 : index
    %32 = vector.load %arg4[%c0_28, %c0_29, %c0_30] : memref<1x2x64xf32, #tpu.memory_space<vmem>>, vector<1x1x32xf32>
    %33 = vector.shape_cast %32 : vector<1x1x32xf32> to vector<1x32xf32>
    %34 = vector.shape_cast %31 : vector<1x32xf32> to vector<1x1x32xf32>
    tpu.vector_store %arg4[%c0_28, %c0_29, %c0_30], %34 {strides = array<i32>} : memref<1x2x64xf32, #tpu.memory_space<vmem>>, vector<1x1x32xf32>,
    %35 = arith.mulf %26, %26 : vector<16x32xf32>
    %cst_31 = arith.constant dense<0.000000e+00> : vector<32xf32>
    %36 = vector.multi_reduction <add>, %35, %cst_31 [0] : vector<16x32xf32> to vector<32xf32>
    %37 = vector.shape_cast %36 : vector<32xf32> to vector<1x32xf32>
    %c0_32 = arith.constant 0 : index
    %c1_33 = arith.constant 1 : index
    %c0_34 = arith.constant 0 : index
    %38 = vector.load %arg4[%c0_32, %c1_33, %c0_34] : memref<1x2x64xf32, #tpu.memory_space<vmem>>, vector<1x1x32xf32>
    %39 = vector.shape_cast %38 : vector<1x1x32xf32> to vector<1x32xf32>
    %40 = vector.shape_cast %37 : vector<1x32xf32> to vector<1x1x32xf32>
    tpu.vector_store %arg4[%c0_32, %c1_33, %c0_34], %40 {strides = array<i32>} : memref<1x2x64xf32, #tpu.memory_space<vmem>>, vector<1x1x32xf32>,
    %c0_35 = arith.constant 0 : index
    %c32 = arith.constant 32 : index
    %41 = vector.load %arg5[%c0_35, %c32] : memref<18x72xf32, #tpu.memory_space<vmem>>, vector<18x40xf32>
    %42 = arith.truncf %41 : vector<18x40xf32> to vector<18x40xbf16>
    %43 = vector.extract_strided_slice %42 {offsets = [0, 0], sizes = [16, 40], strides = [1, 1]} : vector<18x40xbf16> to vector<16x40xbf16>
    %cst_36 = arith.constant dense<0.000000e+00> : vector<16x32xf32>
    %44 = tpu.matmul %43, %12, %cst_36 {dimension_numbers = #tpu.dot_dimension_numbers<[1], [0], [0], [1], [0, 0, 1, 1], [], []>} : vector<16x40xbf16>, vector<40x32xbf16>, vector<16x32xf32> -> vector<16x32xf32>
    %45 = vector.extract_strided_slice %42 {offsets = [1, 0], sizes = [16, 40], strides = [1, 1]} : vector<18x40xbf16> to vector<16x40xbf16>
    %cst_37 = arith.constant dense<0.000000e+00> : vector<16x32xf32>
    %46 = tpu.matmul %45, %14, %cst_37 {dimension_numbers = #tpu.dot_dimension_numbers<[1], [0], [0], [1], [0, 0, 1, 1], [], []>} : vector<16x40xbf16>, vector<40x32xbf16>, vector<16x32xf32> -> vector<16x32xf32>
    %47 = arith.addf %44, %46 : vector<16x32xf32>
    %48 = vector.extract_strided_slice %42 {offsets = [2, 0], sizes = [16, 40], strides = [1, 1]} : vector<18x40xbf16> to vector<16x40xbf16>
    %cst_38 = arith.constant dense<0.000000e+00> : vector<16x32xf32>
    %49 = tpu.matmul %48, %16, %cst_38 {dimension_numbers = #tpu.dot_dimension_numbers<[1], [0], [0], [1], [0, 0, 1, 1], [], []>} : vector<16x40xbf16>, vector<40x32xbf16>, vector<16x32xf32> -> vector<16x32xf32>
    %50 = arith.addf %47, %49 : vector<16x32xf32>
    %c0_39 = arith.constant 0 : index
    %c0_40 = arith.constant 0 : index
    %c32_41 = arith.constant 32 : index
    %51 = vector.load %arg3[%c0_39, %c0_40, %c32_41] : memref<1x16x64xf32, #tpu.memory_space<vmem>>, vector<1x16x32xf32>
    %52 = vector.shape_cast %51 : vector<1x16x32xf32> to vector<16x32xf32>
    %53 = vector.shape_cast %50 : vector<16x32xf32> to vector<1x16x32xf32>
    tpu.vector_store %arg3[%c0_39, %c0_40, %c32_41], %53 {strides = array<i32>} : memref<1x16x64xf32, #tpu.memory_space<vmem>>, vector<1x16x32xf32>,
    %cst_42 = arith.constant dense<0.000000e+00> : vector<32xf32>
    %54 = vector.multi_reduction <add>, %50, %cst_42 [0] : vector<16x32xf32> to vector<32xf32>
    %55 = vector.shape_cast %54 : vector<32xf32> to vector<1x32xf32>
    %c0_43 = arith.constant 0 : index
    %c0_44 = arith.constant 0 : index
    %c32_45 = arith.constant 32 : index
    %56 = vector.load %arg4[%c0_43, %c0_44, %c32_45] : memref<1x2x64xf32, #tpu.memory_space<vmem>>, vector<1x1x32xf32>
    %57 = vector.shape_cast %56 : vector<1x1x32xf32> to vector<1x32xf32>
    %58 = vector.shape_cast %55 : vector<1x32xf32> to vector<1x1x32xf32>
    tpu.vector_store %arg4[%c0_43, %c0_44, %c32_45], %58 {strides = array<i32>} : memref<1x2x64xf32, #tpu.memory_space<vmem>>, vector<1x1x32xf32>,
    %59 = arith.mulf %50, %50 : vector<16x32xf32>
    %cst_46 = arith.constant dense<0.000000e+00> : vector<32xf32>
    %60 = vector.multi_reduction <add>, %59, %cst_46 [0] : vector<16x32xf32> to vector<32xf32>
    %61 = vector.shape_cast %60 : vector<32xf32> to vector<1x32xf32>
    %c0_47 = arith.constant 0 : index
    %c1_48 = arith.constant 1 : index
    %c32_49 = arith.constant 32 : index
    %62 = vector.load %arg4[%c0_47, %c1_48, %c32_49] : memref<1x2x64xf32, #tpu.memory_space<vmem>>, vector<1x1x32xf32>
    %63 = vector.shape_cast %62 : vector<1x1x32xf32> to vector<1x32xf32>
    %64 = vector.shape_cast %61 : vector<1x32xf32> to vector<1x1x32xf32>
    tpu.vector_store %arg4[%c0_47, %c1_48, %c32_49], %64 {strides = array<i32>} : memref<1x2x64xf32, #tpu.memory_space<vmem>>, vector<1x1x32xf32>,
    return
  }
  func.func @transform_0(%arg0: i32) -> (i32, i32, i32) {
    %c0_i32 = arith.constant 0 : i32
    %c0_i32_0 = arith.constant 0 : i32
    %c0_i32_1 = arith.constant 0 : i32
    return %arg0, %c0_i32, %c0_i32_0 : i32, i32, i32
  }
  func.func @transform_1(%arg0: i32) -> (i32, i32, i32) {
    %c0_i32 = arith.constant 0 : i32
    %c0_i32_0 = arith.constant 0 : i32
    %c0_i32_1 = arith.constant 0 : i32
    %c0_i32_2 = arith.constant 0 : i32
    return %c0_i32, %c0_i32_0, %c0_i32_1 : i32, i32, i32
  }
  func.func @transform_2(%arg0: i32) -> (i32, i32, i32) {
    %c0_i32 = arith.constant 0 : i32
    %c0_i32_0 = arith.constant 0 : i32
    %c0_i32_1 = arith.constant 0 : i32
    return %arg0, %c0_i32, %c0_i32_0 : i32, i32, i32
  }
  func.func @transform_3(%arg0: i32) -> (i32, i32, i32) {
    %c0_i32 = arith.constant 0 : i32
    %c0_i32_0 = arith.constant 0 : i32
    %c0_i32_1 = arith.constant 0 : i32
    return %arg0, %c0_i32, %c0_i32_0 : i32, i32, i32
  }
}

module attributes {stable_mosaic.version = 11 : i64} {
  func.func @_bn_add_relu_kernel(%arg0: i32, %arg1: memref<1x16x64xf32, #tpu.memory_space<vmem>>, %arg2: memref<1x16x64xf32, #tpu.memory_space<vmem>>, %arg3: memref<1x64xf32, #tpu.memory_space<vmem>>, %arg4: memref<1x64xf32, #tpu.memory_space<vmem>>, %arg5: memref<1x16x64xf32, #tpu.memory_space<vmem>>) attributes {dimension_semantics = [#tpu.dimension_semantics<parallel>], iteration_bounds = array<i64: 2>, scalar_prefetch = 0 : i64, scratch_operands = 0 : i64, tpu.core_type = #tpu.core_type<tc>, window_params = [{transform_indices = @transform_0, window_bounds = array<i64: 1, 16, 64>}, {transform_indices = @transform_1, window_bounds = array<i64: 1, 16, 64>}, {pipeline_mode = #tpu.pipeline_mode<synchronous>, transform_indices = @transform_2, window_bounds = array<i64: 1, 64>}, {pipeline_mode = #tpu.pipeline_mode<synchronous>, transform_indices = @transform_3, window_bounds = array<i64: 1, 64>}, {transform_indices = @transform_4, window_bounds = array<i64: 1, 16, 64>}]} {
    %c0 = arith.constant 0 : index
    %c0_0 = arith.constant 0 : index
    %c0_1 = arith.constant 0 : index
    %0 = vector.load %arg1[%c0, %c0_0, %c0_1] : memref<1x16x64xf32, #tpu.memory_space<vmem>>, vector<1x16x64xf32>
    %1 = vector.shape_cast %0 : vector<1x16x64xf32> to vector<16x64xf32>
    %c0_2 = arith.constant 0 : index
    %c0_3 = arith.constant 0 : index
    %2 = vector.load %arg3[%c0_2, %c0_3] : memref<1x64xf32, #tpu.memory_space<vmem>>, vector<1x64xf32>
    %3 = vector.broadcast %2 : vector<1x64xf32> to vector<16x64xf32>
    %4 = arith.mulf %1, %3 : vector<16x64xf32>
    %c0_4 = arith.constant 0 : index
    %c0_5 = arith.constant 0 : index
    %5 = vector.load %arg4[%c0_4, %c0_5] : memref<1x64xf32, #tpu.memory_space<vmem>>, vector<1x64xf32>
    %6 = vector.broadcast %5 : vector<1x64xf32> to vector<16x64xf32>
    %7 = arith.addf %4, %6 : vector<16x64xf32>
    %c0_6 = arith.constant 0 : index
    %c0_7 = arith.constant 0 : index
    %c0_8 = arith.constant 0 : index
    %8 = vector.load %arg2[%c0_6, %c0_7, %c0_8] : memref<1x16x64xf32, #tpu.memory_space<vmem>>, vector<1x16x64xf32>
    %9 = vector.shape_cast %8 : vector<1x16x64xf32> to vector<16x64xf32>
    %10 = arith.addf %7, %9 : vector<16x64xf32>
    %cst = arith.constant 0.000000e+00 : f32
    %11 = vector.broadcast %cst : f32 to vector<16x64xf32>
    %12 = arith.maximumf %10, %11 : vector<16x64xf32>
    %c0_9 = arith.constant 0 : index
    %c0_10 = arith.constant 0 : index
    %c0_11 = arith.constant 0 : index
    %13 = vector.load %arg5[%c0_9, %c0_10, %c0_11] : memref<1x16x64xf32, #tpu.memory_space<vmem>>, vector<1x16x64xf32>
    %14 = vector.shape_cast %13 : vector<1x16x64xf32> to vector<16x64xf32>
    %15 = vector.shape_cast %12 : vector<16x64xf32> to vector<1x16x64xf32>
    tpu.vector_store %arg5[%c0_9, %c0_10, %c0_11], %15 {strides = array<i32>} : memref<1x16x64xf32, #tpu.memory_space<vmem>>, vector<1x16x64xf32>,
    return
  }
  func.func @transform_0(%arg0: i32) -> (i32, i32, i32) {
    %c0_i32 = arith.constant 0 : i32
    %c0_i32_0 = arith.constant 0 : i32
    %c0_i32_1 = arith.constant 0 : i32
    return %arg0, %c0_i32, %c0_i32_0 : i32, i32, i32
  }
  func.func @transform_1(%arg0: i32) -> (i32, i32, i32) {
    %c0_i32 = arith.constant 0 : i32
    %c0_i32_0 = arith.constant 0 : i32
    %c0_i32_1 = arith.constant 0 : i32
    return %arg0, %c0_i32, %c0_i32_0 : i32, i32, i32
  }
  func.func @transform_2(%arg0: i32) -> (i32, i32) {
    %c0_i32 = arith.constant 0 : i32
    %c0_i32_0 = arith.constant 0 : i32
    %c0_i32_1 = arith.constant 0 : i32
    return %c0_i32, %c0_i32_0 : i32, i32
  }
  func.func @transform_3(%arg0: i32) -> (i32, i32) {
    %c0_i32 = arith.constant 0 : i32
    %c0_i32_0 = arith.constant 0 : i32
    %c0_i32_1 = arith.constant 0 : i32
    return %c0_i32, %c0_i32_0 : i32, i32
  }
  func.func @transform_4(%arg0: i32) -> (i32, i32, i32) {
    %c0_i32 = arith.constant 0 : i32
    %c0_i32_0 = arith.constant 0 : i32
    %c0_i32_1 = arith.constant 0 : i32
    return %arg0, %c0_i32, %c0_i32_0 : i32, i32, i32
  }
}

module attributes {stable_mosaic.version = 11 : i64} {
  func.func @_bn_relu_conv_stats_kernel(%arg0: i32, %arg1: memref<1x16x64xf32, #tpu.memory_space<vmem>>, %arg2: memref<1x64xf32, #tpu.memory_space<vmem>>, %arg3: memref<1x64xf32, #tpu.memory_space<vmem>>, %arg4: memref<3x40x32xbf16, #tpu.memory_space<vmem>>, %arg5: memref<1x16x64xf32, #tpu.memory_space<vmem>>, %arg6: memref<1x2x64xf32, #tpu.memory_space<vmem>>, %arg7: memref<18x72xf32, #tpu.memory_space<vmem>>) attributes {dimension_semantics = [#tpu.dimension_semantics<parallel>], iteration_bounds = array<i64: 2>, scalar_prefetch = 0 : i64, scratch_operands = 1 : i64, tpu.core_type = #tpu.core_type<tc>, window_params = [{transform_indices = @transform_0, window_bounds = array<i64: 1, 16, 64>}, {pipeline_mode = #tpu.pipeline_mode<synchronous>, transform_indices = @transform_1, window_bounds = array<i64: 1, 64>}, {pipeline_mode = #tpu.pipeline_mode<synchronous>, transform_indices = @transform_2, window_bounds = array<i64: 1, 64>}, {pipeline_mode = #tpu.pipeline_mode<synchronous>, transform_indices = @transform_3, window_bounds = array<i64: 3, 40, 32>}, {transform_indices = @transform_4, window_bounds = array<i64: 1, 16, 64>}, {transform_indices = @transform_5, window_bounds = array<i64: 1, 2, 64>}]} {
    %c0 = arith.constant 0 : index
    %c0_0 = arith.constant 0 : index
    %c0_1 = arith.constant 0 : index
    %0 = vector.load %arg1[%c0, %c0_0, %c0_1] : memref<1x16x64xf32, #tpu.memory_space<vmem>>, vector<1x16x64xf32>
    %1 = vector.shape_cast %0 : vector<1x16x64xf32> to vector<16x64xf32>
    %c0_2 = arith.constant 0 : index
    %c0_3 = arith.constant 0 : index
    %2 = vector.load %arg2[%c0_2, %c0_3] : memref<1x64xf32, #tpu.memory_space<vmem>>, vector<1x64xf32>
    %3 = vector.broadcast %2 : vector<1x64xf32> to vector<16x64xf32>
    %4 = arith.mulf %1, %3 : vector<16x64xf32>
    %c0_4 = arith.constant 0 : index
    %c0_5 = arith.constant 0 : index
    %5 = vector.load %arg3[%c0_4, %c0_5] : memref<1x64xf32, #tpu.memory_space<vmem>>, vector<1x64xf32>
    %6 = vector.broadcast %5 : vector<1x64xf32> to vector<16x64xf32>
    %7 = arith.addf %4, %6 : vector<16x64xf32>
    %cst = arith.constant 0.000000e+00 : f32
    %8 = vector.broadcast %cst : f32 to vector<16x64xf32>
    %9 = arith.maximumf %7, %8 : vector<16x64xf32>
    %cst_6 = arith.constant 0.000000e+00 : f32
    %10 = vector.broadcast %cst_6 : f32 to vector<1x72xf32>
    %c0_7 = arith.constant 0 : index
    %c0_8 = arith.constant 0 : index
    %11 = vector.load %arg7[%c0_7, %c0_8] : memref<18x72xf32, #tpu.memory_space<vmem>>, vector<1x72xf32>
    tpu.vector_store %arg7[%c0_7, %c0_8], %10 {strides = array<i32>} : memref<18x72xf32, #tpu.memory_space<vmem>>, vector<1x72xf32>,
    %cst_9 = arith.constant 0.000000e+00 : f32
    %12 = vector.broadcast %cst_9 : f32 to vector<1x72xf32>
    %c17 = arith.constant 17 : index
    %c0_10 = arith.constant 0 : index
    %13 = vector.load %arg7[%c17, %c0_10] : memref<18x72xf32, #tpu.memory_space<vmem>>, vector<1x72xf32>
    tpu.vector_store %arg7[%c17, %c0_10], %12 {strides = array<i32>} : memref<18x72xf32, #tpu.memory_space<vmem>>, vector<1x72xf32>,
    %cst_11 = arith.constant 0.000000e+00 : f32
    %14 = vector.broadcast %cst_11 : f32 to vector<18x4xf32>
    %c0_12 = arith.constant 0 : index
    %c0_13 = arith.constant 0 : index
    %15 = vector.load %arg7[%c0_12, %c0_13] : memref<18x72xf32, #tpu.memory_space<vmem>>, vector<18x4xf32>
    tpu.vector_store %arg7[%c0_12, %c0_13], %14 {strides = array<i32>} : memref<18x72xf32, #tpu.memory_space<vmem>>, vector<18x4xf32>,
    %cst_14 = arith.constant 0.000000e+00 : f32
    %16 = vector.broadcast %cst_14 : f32 to vector<18x4xf32>
    %c0_15 = arith.constant 0 : index
    %c68 = arith.constant 68 : index
    %17 = vector.load %arg7[%c0_15, %c68] : memref<18x72xf32, #tpu.memory_space<vmem>>, vector<18x4xf32>
    tpu.vector_store %arg7[%c0_15, %c68], %16 {strides = array<i32>} : memref<18x72xf32, #tpu.memory_space<vmem>>, vector<18x4xf32>,
    %c1 = arith.constant 1 : index
    %c4 = arith.constant 4 : index
    %18 = vector.load %arg7[%c1, %c4] : memref<18x72xf32, #tpu.memory_space<vmem>>, vector<16x64xf32>
    tpu.vector_store %arg7[%c1, %c4], %9 {strides = array<i32>} : memref<18x72xf32, #tpu.memory_space<vmem>>, vector<16x64xf32>,
    %c0_16 = arith.constant 0 : index
    %c0_17 = arith.constant 0 : index
    %c0_18 = arith.constant 0 : index
    %19 = vector.load %arg4[%c0_16, %c0_17, %c0_18] : memref<3x40x32xbf16, #tpu.memory_space<vmem>>, vector<1x40x32xbf16>
    %20 = vector.shape_cast %19 : vector<1x40x32xbf16> to vector<40x32xbf16>
    %c1_19 = arith.constant 1 : index
    %c0_20 = arith.constant 0 : index
    %c0_21 = arith.constant 0 : index
    %21 = vector.load %arg4[%c1_19, %c0_20, %c0_21] : memref<3x40x32xbf16, #tpu.memory_space<vmem>>, vector<1x40x32xbf16>
    %22 = vector.shape_cast %21 : vector<1x40x32xbf16> to vector<40x32xbf16>
    %c2 = arith.constant 2 : index
    %c0_22 = arith.constant 0 : index
    %c0_23 = arith.constant 0 : index
    %23 = vector.load %arg4[%c2, %c0_22, %c0_23] : memref<3x40x32xbf16, #tpu.memory_space<vmem>>, vector<1x40x32xbf16>
    %24 = vector.shape_cast %23 : vector<1x40x32xbf16> to vector<40x32xbf16>
    %c0_24 = arith.constant 0 : index
    %c0_25 = arith.constant 0 : index
    %25 = vector.load %arg7[%c0_24, %c0_25] : memref<18x72xf32, #tpu.memory_space<vmem>>, vector<18x40xf32>
    %26 = arith.truncf %25 : vector<18x40xf32> to vector<18x40xbf16>
    %27 = vector.extract_strided_slice %26 {offsets = [0, 0], sizes = [16, 40], strides = [1, 1]} : vector<18x40xbf16> to vector<16x40xbf16>
    %cst_26 = arith.constant dense<0.000000e+00> : vector<16x32xf32>
    %28 = tpu.matmul %27, %20, %cst_26 {dimension_numbers = #tpu.dot_dimension_numbers<[1], [0], [0], [1], [0, 0, 1, 1], [], []>} : vector<16x40xbf16>, vector<40x32xbf16>, vector<16x32xf32> -> vector<16x32xf32>
    %29 = vector.extract_strided_slice %26 {offsets = [1, 0], sizes = [16, 40], strides = [1, 1]} : vector<18x40xbf16> to vector<16x40xbf16>
    %cst_27 = arith.constant dense<0.000000e+00> : vector<16x32xf32>
    %30 = tpu.matmul %29, %22, %cst_27 {dimension_numbers = #tpu.dot_dimension_numbers<[1], [0], [0], [1], [0, 0, 1, 1], [], []>} : vector<16x40xbf16>, vector<40x32xbf16>, vector<16x32xf32> -> vector<16x32xf32>
    %31 = arith.addf %28, %30 : vector<16x32xf32>
    %32 = vector.extract_strided_slice %26 {offsets = [2, 0], sizes = [16, 40], strides = [1, 1]} : vector<18x40xbf16> to vector<16x40xbf16>
    %cst_28 = arith.constant dense<0.000000e+00> : vector<16x32xf32>
    %33 = tpu.matmul %32, %24, %cst_28 {dimension_numbers = #tpu.dot_dimension_numbers<[1], [0], [0], [1], [0, 0, 1, 1], [], []>} : vector<16x40xbf16>, vector<40x32xbf16>, vector<16x32xf32> -> vector<16x32xf32>
    %34 = arith.addf %31, %33 : vector<16x32xf32>
    %c0_29 = arith.constant 0 : index
    %c0_30 = arith.constant 0 : index
    %c0_31 = arith.constant 0 : index
    %35 = vector.load %arg5[%c0_29, %c0_30, %c0_31] : memref<1x16x64xf32, #tpu.memory_space<vmem>>, vector<1x16x32xf32>
    %36 = vector.shape_cast %35 : vector<1x16x32xf32> to vector<16x32xf32>
    %37 = vector.shape_cast %34 : vector<16x32xf32> to vector<1x16x32xf32>
    tpu.vector_store %arg5[%c0_29, %c0_30, %c0_31], %37 {strides = array<i32>} : memref<1x16x64xf32, #tpu.memory_space<vmem>>, vector<1x16x32xf32>,
    %cst_32 = arith.constant dense<0.000000e+00> : vector<32xf32>
    %38 = vector.multi_reduction <add>, %34, %cst_32 [0] : vector<16x32xf32> to vector<32xf32>
    %39 = vector.shape_cast %38 : vector<32xf32> to vector<1x32xf32>
    %c0_33 = arith.constant 0 : index
    %c0_34 = arith.constant 0 : index
    %c0_35 = arith.constant 0 : index
    %40 = vector.load %arg6[%c0_33, %c0_34, %c0_35] : memref<1x2x64xf32, #tpu.memory_space<vmem>>, vector<1x1x32xf32>
    %41 = vector.shape_cast %40 : vector<1x1x32xf32> to vector<1x32xf32>
    %42 = vector.shape_cast %39 : vector<1x32xf32> to vector<1x1x32xf32>
    tpu.vector_store %arg6[%c0_33, %c0_34, %c0_35], %42 {strides = array<i32>} : memref<1x2x64xf32, #tpu.memory_space<vmem>>, vector<1x1x32xf32>,
    %43 = arith.mulf %34, %34 : vector<16x32xf32>
    %cst_36 = arith.constant dense<0.000000e+00> : vector<32xf32>
    %44 = vector.multi_reduction <add>, %43, %cst_36 [0] : vector<16x32xf32> to vector<32xf32>
    %45 = vector.shape_cast %44 : vector<32xf32> to vector<1x32xf32>
    %c0_37 = arith.constant 0 : index
    %c1_38 = arith.constant 1 : index
    %c0_39 = arith.constant 0 : index
    %46 = vector.load %arg6[%c0_37, %c1_38, %c0_39] : memref<1x2x64xf32, #tpu.memory_space<vmem>>, vector<1x1x32xf32>
    %47 = vector.shape_cast %46 : vector<1x1x32xf32> to vector<1x32xf32>
    %48 = vector.shape_cast %45 : vector<1x32xf32> to vector<1x1x32xf32>
    tpu.vector_store %arg6[%c0_37, %c1_38, %c0_39], %48 {strides = array<i32>} : memref<1x2x64xf32, #tpu.memory_space<vmem>>, vector<1x1x32xf32>,
    %c0_40 = arith.constant 0 : index
    %c32 = arith.constant 32 : index
    %49 = vector.load %arg7[%c0_40, %c32] : memref<18x72xf32, #tpu.memory_space<vmem>>, vector<18x40xf32>
    %50 = arith.truncf %49 : vector<18x40xf32> to vector<18x40xbf16>
    %51 = vector.extract_strided_slice %50 {offsets = [0, 0], sizes = [16, 40], strides = [1, 1]} : vector<18x40xbf16> to vector<16x40xbf16>
    %cst_41 = arith.constant dense<0.000000e+00> : vector<16x32xf32>
    %52 = tpu.matmul %51, %20, %cst_41 {dimension_numbers = #tpu.dot_dimension_numbers<[1], [0], [0], [1], [0, 0, 1, 1], [], []>} : vector<16x40xbf16>, vector<40x32xbf16>, vector<16x32xf32> -> vector<16x32xf32>
    %53 = vector.extract_strided_slice %50 {offsets = [1, 0], sizes = [16, 40], strides = [1, 1]} : vector<18x40xbf16> to vector<16x40xbf16>
    %cst_42 = arith.constant dense<0.000000e+00> : vector<16x32xf32>
    %54 = tpu.matmul %53, %22, %cst_42 {dimension_numbers = #tpu.dot_dimension_numbers<[1], [0], [0], [1], [0, 0, 1, 1], [], []>} : vector<16x40xbf16>, vector<40x32xbf16>, vector<16x32xf32> -> vector<16x32xf32>
    %55 = arith.addf %52, %54 : vector<16x32xf32>
    %56 = vector.extract_strided_slice %50 {offsets = [2, 0], sizes = [16, 40], strides = [1, 1]} : vector<18x40xbf16> to vector<16x40xbf16>
    %cst_43 = arith.constant dense<0.000000e+00> : vector<16x32xf32>
    %57 = tpu.matmul %56, %24, %cst_43 {dimension_numbers = #tpu.dot_dimension_numbers<[1], [0], [0], [1], [0, 0, 1, 1], [], []>} : vector<16x40xbf16>, vector<40x32xbf16>, vector<16x32xf32> -> vector<16x32xf32>
    %58 = arith.addf %55, %57 : vector<16x32xf32>
    %c0_44 = arith.constant 0 : index
    %c0_45 = arith.constant 0 : index
    %c32_46 = arith.constant 32 : index
    %59 = vector.load %arg5[%c0_44, %c0_45, %c32_46] : memref<1x16x64xf32, #tpu.memory_space<vmem>>, vector<1x16x32xf32>
    %60 = vector.shape_cast %59 : vector<1x16x32xf32> to vector<16x32xf32>
    %61 = vector.shape_cast %58 : vector<16x32xf32> to vector<1x16x32xf32>
    tpu.vector_store %arg5[%c0_44, %c0_45, %c32_46], %61 {strides = array<i32>} : memref<1x16x64xf32, #tpu.memory_space<vmem>>, vector<1x16x32xf32>,
    %cst_47 = arith.constant dense<0.000000e+00> : vector<32xf32>
    %62 = vector.multi_reduction <add>, %58, %cst_47 [0] : vector<16x32xf32> to vector<32xf32>
    %63 = vector.shape_cast %62 : vector<32xf32> to vector<1x32xf32>
    %c0_48 = arith.constant 0 : index
    %c0_49 = arith.constant 0 : index
    %c32_50 = arith.constant 32 : index
    %64 = vector.load %arg6[%c0_48, %c0_49, %c32_50] : memref<1x2x64xf32, #tpu.memory_space<vmem>>, vector<1x1x32xf32>
    %65 = vector.shape_cast %64 : vector<1x1x32xf32> to vector<1x32xf32>
    %66 = vector.shape_cast %63 : vector<1x32xf32> to vector<1x1x32xf32>
    tpu.vector_store %arg6[%c0_48, %c0_49, %c32_50], %66 {strides = array<i32>} : memref<1x2x64xf32, #tpu.memory_space<vmem>>, vector<1x1x32xf32>,
    %67 = arith.mulf %58, %58 : vector<16x32xf32>
    %cst_51 = arith.constant dense<0.000000e+00> : vector<32xf32>
    %68 = vector.multi_reduction <add>, %67, %cst_51 [0] : vector<16x32xf32> to vector<32xf32>
    %69 = vector.shape_cast %68 : vector<32xf32> to vector<1x32xf32>
    %c0_52 = arith.constant 0 : index
    %c1_53 = arith.constant 1 : index
    %c32_54 = arith.constant 32 : index
    %70 = vector.load %arg6[%c0_52, %c1_53, %c32_54] : memref<1x2x64xf32, #tpu.memory_space<vmem>>, vector<1x1x32xf32>
    %71 = vector.shape_cast %70 : vector<1x1x32xf32> to vector<1x32xf32>
    %72 = vector.shape_cast %69 : vector<1x32xf32> to vector<1x1x32xf32>
    tpu.vector_store %arg6[%c0_52, %c1_53, %c32_54], %72 {strides = array<i32>} : memref<1x2x64xf32, #tpu.memory_space<vmem>>, vector<1x1x32xf32>,
    return
  }
  func.func @transform_0(%arg0: i32) -> (i32, i32, i32) {
    %c0_i32 = arith.constant 0 : i32
    %c0_i32_0 = arith.constant 0 : i32
    %c0_i32_1 = arith.constant 0 : i32
    return %arg0, %c0_i32, %c0_i32_0 : i32, i32, i32
  }
  func.func @transform_1(%arg0: i32) -> (i32, i32) {
    %c0_i32 = arith.constant 0 : i32
    %c0_i32_0 = arith.constant 0 : i32
    %c0_i32_1 = arith.constant 0 : i32
    return %c0_i32, %c0_i32_0 : i32, i32
  }
  func.func @transform_2(%arg0: i32) -> (i32, i32) {
    %c0_i32 = arith.constant 0 : i32
    %c0_i32_0 = arith.constant 0 : i32
    %c0_i32_1 = arith.constant 0 : i32
    return %c0_i32, %c0_i32_0 : i32, i32
  }
  func.func @transform_3(%arg0: i32) -> (i32, i32, i32) {
    %c0_i32 = arith.constant 0 : i32
    %c0_i32_0 = arith.constant 0 : i32
    %c0_i32_1 = arith.constant 0 : i32
    %c0_i32_2 = arith.constant 0 : i32
    return %c0_i32, %c0_i32_0, %c0_i32_1 : i32, i32, i32
  }
  func.func @transform_4(%arg0: i32) -> (i32, i32, i32) {
    %c0_i32 = arith.constant 0 : i32
    %c0_i32_0 = arith.constant 0 : i32
    %c0_i32_1 = arith.constant 0 : i32
    return %arg0, %c0_i32, %c0_i32_0 : i32, i32, i32
  }
  func.func @transform_5(%arg0: i32) -> (i32, i32, i32) {
    %c0_i32 = arith.constant 0 : i32
    %c0_i32_0 = arith.constant 0 : i32
    %c0_i32_1 = arith.constant 0 : i32
    return %arg0, %c0_i32, %c0_i32_0 : i32, i32, i32
  }
}

</mosaic_0001>

<bundles_post_ra>
// kernel: tile.24
= control target key start
LH: loop header
LB: loop body
LE: loop exit
PB: predicated region body
PF: predicated region fallthrough
CT: control target
= control target key end

     0   :  { %s133_s10 = smov 60   ;;  %s134_s11 = smov 52   ;;  %vm3_vm0 = vcmask 31744   ;;  %vm9_vm1 = vcmask 523744   ;;  %vm15_vm2 = vcmask 490944   ;;  %vm21_vm3 = vcmask 458144   ;;  %s209_s0 = inlined_call_operand.vmem [shape: f32[16,4], index: 0, kind: input, shape index: {}]   ;;  %s210_s1 = inlined_call_operand.vmem [shape: f32[1,64], index: 1, kind: output, shape index: {}]  }
   0x1   :  { %v103_v0 = vld [vmem:[%s209_s0 + $0xf] sm:$0x1]   ;;  %v105_v1 = vld [vmem:[%s209_s0 + $0xd] sm:$0x1]   ;;  %v104_v2 = vld [vmem:[%s209_s0 + $0xe] sm:$0x1]  }
   0x2   :  { %7 = vrot.lane.b32.xlu0 %v103_v0, %s133_s10  ;;  %19 = vrot.lane.b32.xlu1 %v105_v1, %s134_s11  ;;  %v106_v3 = vld [vmem:[%s209_s0 + $0xc] sm:$0x1]   ;;  %s135_s16 = smov 56   ;;  %s136_s17 = smov 48   ;;  %v107_v4 = vld [vmem:[%s209_s0 + $0xb] sm:$0x1]  }
   0x3   :  { %v108_v5 = vld [vmem:[%s209_s0 + $0xa] sm:$0x1]   ;;  %v2_v6 = vld [vmem:[%s209_s0] sm:$0x1]   ;;  %s137_s24 = smov 44   ;;  %s138_s25 = smov 40  }
   0x4   :  { %4 = vst.msk [vmem:[#allocation0] sm:$0x1] %vm3_vm0, %v2_v6   ;;  %v109_v7 = vld [vmem:[%s209_s0 + $0x9] sm:$0x1]   ;;  %v110_v8 = vld [vmem:[%s209_s0 + $0x8] sm:$0x1]  }
   0x5   :  { %s139_s30 = smov 36   ;;  %s140_s2 = smov 32   ;;  %v111_v9 = vld [vmem:[%s209_s0 + $0x7] sm:$0x1]   ;;  %v112_v10 = vld [vmem:[%s209_s0 + $0x6] sm:$0x1]  }
   0x6   :  { %13 = vrot.lane.b32.xlu0 %v104_v2, %s135_s16  ;;  %25 = vrot.lane.b32.xlu1 %v106_v3, %s136_s17  ;;  %s141_s7 = smov 28   ;;  %s142_s8 = smov 24   ;;  %v113_v11 = vld [vmem:[%s209_s0 + $0x5] sm:$0x1]   ;;  %v114_v12 = vld [vmem:[%s209_s0 + $0x4] sm:$0x1]  }
   0x7   :  { %s143_s13 = smov 20   ;;  %s144_s14 = smov 16   ;;  %v115_v13 = vld [vmem:[%s209_s0 + $0x3] sm:$0x1]   ;;  %v116_v14 = vld [vmem:[%s209_s0 + $0x2] sm:$0x1]  }
   0x8   :  { %s145_s19 = smov 12   ;;  %s146_s20 = smov 8   ;;  %v117_v15 = vld [vmem:[%s209_s0 + $0x1] sm:$0x1]   ;;  %vm27_vm4 = vcmask 425344   ;;  %vm33_vm5 = vcmask 392544  }
   0x9   :  { %s147_s0 = smov 4   ;;  %vm39_vm6 = vcmask 359744   ;;  %vm45_vm7 = vcmask 326944   ;;  %vm51_vm8 = vcmask 294144   ;;  %vm57_vm9 = vcmask 261344  }
   0xa   :  { %31 = vrot.lane.b32.xlu0 %v107_v4, %s137_s24  ;;  %37 = vrot.lane.b32.xlu1 %v108_v5, %s138_s25  ;;  %vm63_vm10 = vcmask 228544   ;;  %vm69_vm11 = vcmask 195744   ;;  %vm75_vm12 = vcmask 162944   ;;  %vm81_vm13 = vcmask 130144  }
   0xb   :  { %vm87_vm14 = vcmask 97344   ;;  %vm93_vm15 = vcmask 64544  }
   0xe   :  { %43 = vrot.lane.b32.xlu0 %v109_v7, %s139_s30  ;;  %49 = vrot.lane.b32.xlu1 %v110_v8, %s140_s2 }
  0x12   :  { %55 = vrot.lane.b32.xlu0 %v111_v9, %s141_s7  ;;  %61 = vrot.lane.b32.xlu1 %v112_v10, %s142_s8 }
  0x16   :  { %67 = vrot.lane.b32.xlu0 %v113_v11, %s143_s13  ;;  %73 = vrot.lane.b32.xlu1 %v114_v12, %s144_s14 }
  0x1a   :  { %79 = vrot.lane.b32.xlu0 %v115_v13, %s145_s19  ;;  %85 = vrot.lane.b32.xlu1 %v116_v14, %s146_s20 }
  0x1e   :  { %91 = vrot.lane.b32.xlu0 %v117_v15, %s147_s0 }
  0x74   :  { %v8_v16 = vpop.permute.xlu0 %7   ;;  %v20_v17 = vpop.permute.xlu1 %19  }
  0x75   :  { %10 = vst.msk [vmem:[#allocation0] sm:$0x1] %vm9_vm1, %v8_v16  }
  0x78   :  { %v14_v18 = vpop.permute.xlu0 %13   ;;  %v26_v19 = vpop.permute.xlu1 %25  }
  0x79   :  { %16 = vst.msk [vmem:[#allocation0] sm:$0x1] %vm15_vm2, %v14_v18  }
  0x7a   :  { %22 = vst.msk [vmem:[#allocation0] sm:$0x1] %vm21_vm3, %v20_v17  }
  0x7b   :  { %28 = vst.msk [vmem:[#allocation0] sm:$0x1] %vm27_vm4, %v26_v19  }
  0x7c   :  { %v32_v20 = vpop.permute.xlu0 %31   ;;  %v38_v21 = vpop.permute.xlu1 %37  }
  0x7d   :  { %34 = vst.msk [vmem:[#allocation0] sm:$0x1] %vm33_vm5, %v32_v20  }
  0x7e   :  { %40 = vst.msk [vmem:[#allocation0] sm:$0x1] %vm39_vm6, %v38_v21  }
  0x80   :  { %v44_v22 = vpop.permute.xlu0 %43   ;;  %v50_v23 = vpop.permute.xlu1 %49  }
  0x81   :  { %46 = vst.msk [vmem:[#allocation0] sm:$0x1] %vm45_vm7, %v44_v22  }
  0x82   :  { %52 = vst.msk [vmem:[#allocation0] sm:$0x1] %vm51_vm8, %v50_v23  }
  0x84   :  { %v56_v24 = vpop.permute.xlu0 %55   ;;  %v62_v25 = vpop.permute.xlu1 %61  }
  0x85   :  { %58 = vst.msk [vmem:[#allocation0] sm:$0x1] %vm57_vm9, %v56_v24  }
  0x86   :  { %64 = vst.msk [vmem:[#allocation0] sm:$0x1] %vm63_vm10, %v62_v25  }
  0x88   :  { %v68_v26 = vpop.permute.xlu0 %67   ;;  %v74_v27 = vpop.permute.xlu1 %73  }
  0x89   :  { %70 = vst.msk [vmem:[#allocation0] sm:$0x1] %vm69_vm11, %v68_v26  }
  0x8a   :  { %76 = vst.msk [vmem:[#allocation0] sm:$0x1] %vm75_vm12, %v74_v27  }
  0x8c   :  { %v80_v28 = vpop.permute.xlu0 %79   ;;  %v86_v29 = vpop.permute.xlu1 %85  }
  0x8d   :  { %82 = vst.msk [vmem:[#allocation0] sm:$0x1] %vm81_vm13, %v80_v28  }
  0x8e   :  { %88 = vst.msk [vmem:[#allocation0] sm:$0x1] %vm87_vm14, %v86_v29  }
  0x90   :  { %v92_v30 = vpop.permute.xlu0 %91  }
  0x91   :  { %94 = vst.msk [vmem:[#allocation0] sm:$0x1] %vm93_vm15, %v92_v30  }
  0x98   :  { %v99_v31 = vld [vmem:[#allocation0] sm:$0x1] }
  0x99   :  { %102 = vst [vmem:[%s210_s1] sm:$0x1] %v99_v31 }

// kernel: tile.23
= control target key start
LH: loop header
LB: loop body
LE: loop exit
PB: predicated region body
PF: predicated region fallthrough
CT: control target
= control target key end

     0   :  { %s28_s0 = inlined_call_operand.vmem [shape: f32[4], index: 0, kind: input, shape index: {}]   ;;  %s29_s1 = inlined_call_operand.vmem [shape: f32[16,4], index: 1, kind: output, shape index: {}]  }
   0x1   :  { %v4_v0 = vld [vmem:[%s28_s0] ss:$0 sm:$0xff] }
   0x2   :  { %5 = vst [vmem:[%s29_s1] sm:$0xff] %v4_v0  ;;  %8 = vst [vmem:[%s29_s1 + $0x8] sm:$0xff] %v4_v0 }

// kernel: basic_block_apply.5
= control target key start
LH: loop header
LB: loop body
LE: loop exit
PB: predicated region body
PF: predicated region fallthrough
CT: control target
= control target key end

     0   :  { %s373_s15 = smov 0   ;;  %s399_s0 = inlined_call_operand.vmem [shape: f32[2,16,64], index: 0, kind: input, shape index: {}]   ;;  %s400_s1 = inlined_call_operand.vmem [shape: f32[2,16,64], index: 1, kind: input, shape index: {}]   ;;  %s401_s2 = inlined_call_operand.vmem [shape: f32[1,64], index: 2, kind: input, shape index: {}]   ;;  %s402_s3 = inlined_call_operand.vmem [shape: f32[1,64], index: 3, kind: input, shape index: {}]   ;;  %s403_s4 = inlined_call_operand.vmem [shape: f32[2,16,64], index: 4, kind: output, shape index: {}]  }
   0x1 LB: > { %s314_s16 = sadd.s32 4294967295, %s346_s15   ;;  %p318_p0 = scmp.ge.s32.totalorder %s346_s15, 1  ;;  %s346_s15 = sphi %s373_s15, %s14_s15  }
   0x2   : > { %p172_p1 = scmp.lt.s32.totalorder %s346_s15, 3 }
   0x4   : > { %p173_p2 = pnand %p318_p0, %p172_p1 }
   0x5   : > { %p203_p3 = scmp.lt.s32.totalorder (!%p173_p2), %s314_s16, 1 }
   0x6   : > { %176 = sbr.rel (%p173_p2) target bundleno = 24 (0x18), region = 36 }
   0xb   : > { %s405_s16 = smov (!%p203_p3, %s314_s16), 1  ;;  %v325_v0 = vld [vmem:[%s401_s2] ss:$0 sm:$0xff]  ;;  %vm244_vm0 = vcmask 523264  }
   0xc   : > { %s329_s17 = sshll.u32 %s405_s16, 4  ;;  %v326_v3 = vld [vmem:[%s402_s3] ss:$0 sm:$0xff] }
   0xd   : > { %s207_s22 = scalar_lea.vmem %s399_s0, %s329_s17  ;;  %s212_s25 = scalar_lea.vmem %s400_s1, %s329_s17 }
   0xe   : > { %v218_v1 = vld [vmem:[%s207_s22] sm:$0xff]  ;;  %v219_v2 = vld [vmem:[%s207_s22 + $0x8] sm:$0xff]  ;;  %s217_s30 = scalar_lea.vmem %s403_s4, %s329_s17 }
   0xf   : > { %v227_v4 = vmul.f32 %v325_v0, %v218_v1  ;;  %v228_v5 = vmul.f32 %v325_v0, %v219_v2  ;;  %v238_v6 = vld [vmem:[%s212_s25] sm:$0xff]  ;;  %v239_v7 = vld [vmem:[%s212_s25 + $0x8] sm:$0xff] }
  0x11   : > { %v236_v8 = vadd.f32 %v326_v3, %v227_v4  ;;  %v237_v9 = vadd.f32 %v326_v3, %v228_v5 }
  0x13   : > { %v240_v10 = vadd.f32 %v238_v6, %v236_v8  ;;  %v241_v11 = vadd.f32 %v239_v7, %v237_v9 }
  0x15   : > { %v242_v12 = vmax.f32 %v240_v10, 0.0  ;;  %v243_v13 = vmax.f32 %v241_v11, 0.0 }
  0x17   : > { %245 = vst.msk [vmem:[%s217_s30] sm:$0xff] %vm244_vm0, %v242_v12  ;;  %246 = vst.msk [vmem:[%s217_s30 + $0x8] sm:$0xff] %vm244_vm0, %v243_v13 }
  0x18 PF: > { %s14_s15 = sadd.s32 1, %s346_s15  }
  0x19   : > { %p11_p4 = scmp.ge.s32.totalorder %s14_s15, 4  }
  0x1b   :  { %13 = sbr.rel (!%p11_p4) target bundleno = 1 (0x1), region = 69 }

// kernel: basic_block_apply.3
= control target key start
LH: loop header
LB: loop body
LE: loop exit
PB: predicated region body
PF: predicated region fallthrough
CT: control target
= control target key end

     0   :  { %s933_s12 = smov 0   ;;  %s1071_s0 = inlined_call_operand.vmem [shape: f32[2,16,64], index: 0, kind: input, shape index: {}]   ;;  %s1072_s1 = inlined_call_operand.vmem [shape: bf16[3,40,32], index: 1, kind: input, shape index: {}]   ;;  %s1073_s2 = inlined_call_operand.vmem [shape: f32[2,16,64], index: 2, kind: output, shape index: {0}]   ;;  %s1074_s3 = inlined_call_operand.vmem [shape: f32[2,2,64], index: 3, kind: output, shape index: {1}]  }
   0x1 LB: > { %s755_s13 = sadd.s32 4294967295, %s906_s12   ;;  %p759_p0 = scmp.ge.s32.totalorder %s906_s12, 1  ;;  %s906_s12 = sphi %s933_s12, %s14_s12  }
   0x2   : > { %p140_p1 = scmp.lt.s32.totalorder %s906_s12, 3 }
   0x4   : > { %p141_p2 = pnand %p759_p0, %p140_p1 }
   0x5   : > { %p168_p3 = scmp.lt.s32.totalorder (!%p141_p2), %s755_s13, 1  ;;  %s909_s26 = smov (!%p141_p2), 4  }
   0x6   : > { %144 = sbr.rel (%p141_p2) target bundleno = 611 (0x263), region = 28  ;;  %s911_s6 = smov (!%p141_p2), 96  }
   0xb   : > { %vm185_vm0 = vcmask 581632   ;;  %vm188_vm1 = vcmask 31744   ;;  %vm193_vm2 = vcmask 589344   ;;  %v908_v0 = vmov 0.0   ;;  %v891_v1 = vld [vmem:[%s1072_s1 + $0x10] ss:$0 sps:$4 sm:$0xff]  }
   0xc   : > { %186 = vst.msk [vmem:[#allocation2] sm:$0x1] %vm185_vm0, %v908_v0  ;;  %187 = vst.msk [vmem:[#allocation2 + $0x11] sm:$0x1] %vm185_vm0, %v908_v0  ;;  %828 = vmatprep.subr.bf16.mxu1 %v908_v0  ;;  %vm263_vm3 = vcmask 1043456   ;;  %818 = vmatprep.subr.bf16.mxu0 %v908_v0  ;;  %s1076_s13 = smov (!%p168_p3, %s755_s13), 1 }
   0xd   : > { %190 = vst.msk [vmem:[#allocation2 + $0x8] sm:$0xff] %vm188_vm1, %v908_v0  ;;  %189 = vst.msk [vmem:[#allocation2] sm:$0xff] %vm188_vm1, %v908_v0  ;;  %vm191_vm4 = vcmask 25600   ;;  %vm196_vm5 = vcmask 583200   ;;  %v955_v2 = vsel %vm263_vm3, %v891_v1, 0  ;;  %s792_s16 = sshll.u32 %s1076_s13, 4 }
   0xe   : > { %195 = vst.msk [vmem:[#allocation2 + $0x8] sm:$0xff] %vm193_vm2, %v908_v0  ;;  %194 = vst.msk [vmem:[#allocation2] sm:$0xff] %vm193_vm2, %v908_v0  ;;  %829 = vmatpush3.bf16.msra.mxu1 %v955_v2  ;;  %v964_v3 = vld [vmem:[%s1072_s1 + $0x8] sm:$0xff]   ;;  %v893_v4 = vld [vmem:[%s1072_s1 + $0x24] ss:$0 sps:$4 sm:$0xff]   ;;  %s172_s23 = scalar_lea.vmem %s1071_s0, %s792_s16  ;;  %vm910_vm6 = vmmov 0   ;;  %s1042_s15 = scalar_lea.vmem %s1073_s2, %s792_s16 }
   0xf   : > { %192 = vst.msk [vmem:[#allocation2 + $0x10] sm:$0x3] %vm191_vm4, %v908_v0  ;;  %830 = vmatprep.subr.bf16.mxu1 %v908_v0  ;;  %v183_v5 = vld [vmem:[%s172_s23] sm:$0xff]  ;;  %v265_v6 = vsel %vm263_vm3, %v893_v4, 0  ;;  %v184_v8 = vld [vmem:[%s172_s23 + $0x8] sm:$0xff]  ;;  %834 = vmatprep.mubr.msk.bf16.mxu1 %vm910_vm6, %v908_v0  ;;  %v896_v10 = vld [vmem:[%s1072_s1 + $0x14] sm:$0xff]  }
  0x10   : > { %197 = vst.msk [vmem:[#allocation2 + $0x10] sm:$0x3] %vm196_vm5, %v908_v0  ;;  %v895_v7 = vld [vmem:[%s1072_s1 + $0x1c] sm:$0xff]   ;;  %200 = vrot.lane.b32.xlu0 %v183_v5, %s909_s26  ;;  %819 = vmatpush3.bf16.msra.mxu0 %v265_v6  ;;  %vm206_vm7 = vcmask 556064   ;;  %vm259_vm8 = vcmask 326656   ;;  %vm371_vm9 = vcmask 1046528  }
  0x11   : > { %v983_v9 = vld [vmem:[%s1072_s1] sm:$0xff]   ;;  %820 = vmatprep.subr.bf16.mxu0 %v908_v0  ;;  %824 = vmatprep.mubr.msk.bf16.mxu0 %vm910_vm6, %v908_v0  ;;  %v897_v28 = vld [vmem:[%s1072_s1 + $0x38] ss:$0 sps:$4 sm:$0xff]   ;;  %vm231_vm10 = vsmask.f32 7424  ;;  %v898_v35 = vld [vmem:[%s1072_s1 + $0x30] sm:$0xff]  }
  0x12   : > { %831 = vmatpush3.bf16.msra.mxu1 %v964_v3  ;;  %v394_v33 = vsel %vm263_vm3, %v897_v28, 0  ;;  %v899_v36 = vld [vmem:[%s1072_s1 + $0x28] sm:$0xff]   ;;  %vm439_vm11 = vcmask 261120   ;;  %s764_s16 = sshll.u32 %s1076_s13, 1  ;;  %vm451_vm12 = vcmask 253952   ;;  %s912_s13 = smov 32  }
  0x13   : > { %832 = vmatprep.subr.bf16.mxu1 %v908_v0  ;;  %s1056_s19 = scalar_lea.vmem %s1074_s3, %s764_s16  ;;  %vm635_vm13 = vcmask 523520   ;;  %vm651_vm14 = vcmask 516352  }
  0x14   : > { %202 = vrot.lane.b32.xlu0 %v184_v8, %s909_s26  ;;  %821 = vmatpush3.bf16.msra.mxu0 %v895_v7 }
  0x15   : > { %822 = vmatprep.subr.bf16.mxu0 %v908_v0 }
  0x16   : > { %833 = vmatpush3.bf16.msra.mxu1 %v983_v9 }
  0x17   : > { %848 = vmatprep.subr.bf16.mxu1 %v908_v0 }
  0x18   : > { %823 = vmatpush3.bf16.msra.mxu0 %v896_v10 }
  0x19   : > { %838 = vmatprep.subr.bf16.mxu0 %v908_v0 }
  0x82   : > { %v201_v11 = vpop.permute.xlu0 %200 }
  0x83   : > { %207 = vst.msk [vmem:[#allocation2 + $0x1] sm:$0xff] %vm206_vm7, %v201_v11 }
  0x86   : > { %v203_v12 = vpop.permute.xlu0 %202 }
  0x87   : > { %208 = vst.msk [vmem:[#allocation2 + $0x9] sm:$0xff] %vm206_vm7, %v203_v12 }
  0x8a   : > { %v226_v13 = vld [vmem:[#allocation2] sm:$0xff] }
  0x8e   : > { %v227_v14 = vld [vmem:[#allocation2 + $0x8] sm:$0xff]  ;;  %v467_v15 = vld [vmem:[#allocation2 + $0x10] sm:$0x3] }
  0x8f   : > { %v228_v16 = vld [vmem:[#allocation2 + $0x10] sm:$0x3]  ;;  %v229_v17 = vpack.c.bf16 %v227_v14, %v226_v13  ;;  %v469_v18 = vpack.c.bf16 %v467_v15, %v467_v15 }
  0x90   : > { %v230_v19 = vpack.c.bf16 %v228_v16, %v228_v16 }
  0x91   : > { %835 = vmatmul.mubr.msk.bf16.vlgmr.msra.gmra.mxu1 %vm259_vm8, %v229_v17  ;;  %v576_v20 = vrot.slane %v229_v17, 1  ;;  %v577_v21 = vrot.slane %v469_v18, 1  ;;  %v473_v22 = vshll.u32 %v229_v17, 16  ;;  %v478_v23 = vshll.u32 %v469_v18, 16 }
  0x92   : > { %v240_v24 = vshll.u32 %v230_v19, 16  ;;  %849 = vmatpush3.bf16.msra.mxu1 %v265_v6  ;;  %854 = vmatprep.mubr.msk.bf16.mxu1 %vm910_vm6, %v908_v0  ;;  %v471_v26 = vshrl.u32 %v229_v17, 16  ;;  %v373_v37 = vrot.slane %v230_v19, 1 }
  0x93   : > { %v578_v25 = vsel %vm371_vm9, %v576_v20, %v577_v21  ;;  %v475_v27 = vrot.slane %v473_v22, 1  ;;  %850 = vmatprep.subr.bf16.mxu1 %v908_v0  ;;  %v480_v30 = vrot.slane %v478_v23, 1 }
  0x94   : > { %579 = vrot.lane.b32.xlu0 %v578_v25, %s911_s6  ;;  %v242_v31 = vrot.slane %v240_v24, 1  ;;  %v374_v38 = vsel %vm371_vm9, %v576_v20, %v373_v37 }
  0x95   : > { %v476_v29 = vor.u32 %v475_v27, %v471_v26 }
  0x96   : > { %851 = vmatpush3.bf16.msra.mxu1 %v895_v7 }
  0x97   : > { %v481_v32 = vsel %vm231_vm10, %v476_v29, %v480_v30  ;;  %852 = vmatprep.subr.bf16.mxu1 %v908_v0  ;;  %v243_v34 = vsel %vm231_vm10, %v476_v29, %v242_v31 }
  0x98   : > { %482 = vrot.lane.b32.xlu1 %v481_v32, %s911_s6  ;;  %825 = vmatmul.mubr.msk.bf16.vlgmr.msra.gmra.mxu0 %vm259_vm8, %v243_v34 }
  0x99   : > { %839 = vmatpush3.bf16.msra.mxu0 %v394_v33  ;;  %844 = vmatprep.mubr.msk.bf16.mxu0 %vm910_vm6, %v908_v0 }
  0x9a   : > { %840 = vmatprep.subr.bf16.mxu0 %v908_v0  ;;  %853 = vmatpush3.bf16.msra.mxu1 %v896_v10 }
  0x9b   : > { %868 = vmatprep.subr.bf16.mxu1 %v908_v0 }
  0x9c   : > { %529 = vrot.lane.b32.xlu1 %v229_v17, %s911_s6 }
  0x9d   : > { %841 = vmatpush3.bf16.msra.mxu0 %v898_v35 }
  0x9e   : > { %842 = vmatprep.subr.bf16.mxu0 %v908_v0 }
  0xa1   : > { %843 = vmatpush3.bf16.msra.mxu0 %v899_v36 }
  0xa2   : > { %858 = vmatprep.subr.bf16.mxu0 %v908_v0 }
  0xa4   : > { %845 = vmatmul.mubr.msk.bf16.vlgmr.msra.gmra.mxu0 %vm259_vm8, %v374_v38 }
  0xa5   : > { %859 = vmatpush3.bf16.msra.mxu0 %v955_v2  ;;  %864 = vmatprep.mubr.msk.bf16.mxu0 %vm910_vm6, %v908_v0 }
  0xa6   : > { %860 = vmatprep.subr.bf16.mxu0 %v908_v0 }
  0xa9   : > { %861 = vmatpush3.bf16.msra.mxu0 %v964_v3 }
  0xaa   : > { %862 = vmatprep.subr.bf16.mxu0 %v908_v0 }
  0xad   : > { %863 = vmatpush3.bf16.msra.mxu0 %v983_v9 }
 0x106   : > { %v580_v41 = vpop.permute.xlu0 %579 }
 0x10a   : > { %v483_v39 = vpop.permute.xlu1 %482 }
 0x10b   : > { %855 = vmatmul.mubr.msk.bf16.vlgmr.msra.gmra.mxu1 %vm259_vm8, %v483_v39 }
 0x10c   : > { %869 = vmatpush3.bf16.msra.mxu1 %v394_v33  ;;  %874 = vmatprep.mubr.msk.bf16.mxu1 %vm910_vm6, %v908_v0 }
 0x10d   : > { %870 = vmatprep.subr.bf16.mxu1 %v908_v0 }
 0x10e   : > { %v530_v40 = vpop.permute.xlu1 %529 }
 0x10f   : > { %865 = vmatmul.mubr.msk.bf16.vlgmr.msra.gmra.mxu0 %vm259_vm8, %v530_v40 }
 0x110   : > { %871 = vmatpush3.bf16.msra.mxu1 %v898_v35 }
 0x111   : > { %872 = vmatprep.subr.bf16.mxu1 %v908_v0 }
 0x114   : > { %873 = vmatpush3.bf16.msra.mxu1 %v899_v36 }
 0x117   : > { %875 = vmatmul.mubr.msk.bf16.vlgmr.msra.gmra.mxu1 %vm259_vm8, %v580_v41 }
 0x151   : > { %v362_v42 = vpop.f32.mrf.mxu1 }
 0x153   : > { %v836_v43 = vpop.f32.mrf.mxu1 }
 0x155   : > { %v365_v44 = vpop.f32.mrf.mxu1 }
 0x157   : > { %v837_v45 = vpop.f32.mrf.mxu1 }
 0x158   : > { %v301_v46 = vpop.f32.mrf.mxu0 }
 0x159   : > { %v363_v50 = vadd.f32 %v362_v42, %v301_v46 }
 0x15a   : > { %v826_v47 = vpop.f32.mrf.mxu0 }
 0x15c   : > { %v304_v48 = vpop.f32.mrf.mxu0 }
 0x15d   : > { %v366_v54 = vadd.f32 %v365_v44, %v304_v48 }
 0x15e   : > { %v827_v49 = vpop.f32.mrf.mxu0 }
 0x164   : > { %v430_v51 = vpop.f32.mrf.mxu0 }
 0x165   : > { %v437_v52 = vadd.f32 %v430_v51, %v363_v50 }
 0x166   : > { %v846_v53 = vpop.f32.mrf.mxu0 }
 0x167   : > { %440 = vst.msk [vmem:[%s1042_s15] sm:$0xff] %vm439_vm11, %v437_v52  ;;  %v453_v56 = vmul.f32 %v437_v52, %v437_v52  ;;  %v442_v59 = vsel %vm439_vm11, %v437_v52, 0.0 }
 0x168   : > { %v433_v55 = vpop.f32.mrf.mxu0 }
 0x169   : > { %v438_v57 = vadd.f32 %v433_v55, %v366_v54  ;;  %v455_v63 = vsel %vm439_vm11, %v453_v56, 0.0 }
 0x16a   : > { %v847_v58 = vpop.f32.mrf.mxu0 }
 0x16b   : > { %441 = vst.msk [vmem:[%s1042_s15 + $0x8] sm:$0xff] %vm439_vm11, %v438_v57  ;;  %v443_v60 = vsel %vm439_vm11, %v438_v57, 0.0  ;;  %v454_v61 = vmul.f32 %v438_v57, %v438_v57 }
 0x16c   : > { %v444_v62 = vadd.f32 %v443_v60, %v442_v59 }
 0x16d   : > { %v456_v0 = vsel %vm439_vm11, %v454_v61, 0.0 }
 0x16e   : > { %v445_v1 = vrot.slane %v444_v62, 4  ;;  %v457_v2 = vadd.f32 %v456_v0, %v455_v63 }
 0x170   : > { %v446_v3 = vadd.f32 %v445_v1, %v444_v62  ;;  %v458_v4 = vrot.slane %v457_v2, 4 }
 0x172   : > { %v447_v5 = vrot.slane %v446_v3, 2  ;;  %v459_v6 = vadd.f32 %v458_v4, %v457_v2 }
 0x174   : > { %v448_v7 = vadd.f32 %v447_v5, %v446_v3  ;;  %v460_v8 = vrot.slane %v459_v6, 2 }
 0x176   : > { %v449_v9 = vrot.slane %v448_v7, 1  ;;  %v461_v10 = vadd.f32 %v460_v8, %v459_v6 }
 0x178   : > { %v450_v11 = vadd.f32 %v449_v9, %v448_v7  ;;  %v462_v12 = vrot.slane %v461_v10, 1 }
 0x17a   : > { %452 = vst.msk [vmem:[%s1056_s19] sm:$0x1] %vm451_vm12, %v450_v11  ;;  %v463_v13 = vadd.f32 %v462_v12, %v461_v10 }
 0x17c   : > { %464 = vst.msk [vmem:[%s1056_s19 + $0x1] sm:$0x1] %vm451_vm12, %v463_v13 }
 0x1cb   : > { %v521_v14 = vpop.f32.mrf.mxu1 }
 0x1cd   : > { %v856_v15 = vpop.f32.mrf.mxu1 }
 0x1cf   : > { %v524_v16 = vpop.f32.mrf.mxu1  ;;  %v568_v17 = vpop.f32.mrf.mxu0 }
 0x1d0   : > { %v569_v22 = vadd.f32 %v568_v17, %v521_v14 }
 0x1d1   : > { %v857_v18 = vpop.f32.mrf.mxu1  ;;  %v866_v19 = vpop.f32.mrf.mxu0 }
 0x1d3   : > { %v571_v20 = vpop.f32.mrf.mxu0 }
 0x1d4   : > { %v572_v26 = vadd.f32 %v571_v20, %v524_v16 }
 0x1d5   : > { %v867_v21 = vpop.f32.mrf.mxu0 }
 0x1d7   : > { %v618_v23 = vpop.f32.mrf.mxu1 }
 0x1d8   : > { %v625_v24 = vadd.f32 %v618_v23, %v569_v22 }
 0x1d9   : > { %v876_v25 = vpop.f32.mrf.mxu1 }
 0x1da   : > { %629 = vrot.lane.b32.xlu1 %v625_v24, %s912_s13  ;;  %v653_v28 = vmul.f32 %v625_v24, %v625_v24  ;;  %v638_v31 = vsel %vm439_vm11, %v625_v24, 0.0 }
 0x1db   : > { %v621_v27 = vpop.f32.mrf.mxu1 }
 0x1dc   : > { %v626_v29 = vadd.f32 %v621_v27, %v572_v26  ;;  %v655_v35 = vsel %vm439_vm11, %v653_v28, 0.0 }
 0x1dd   : > { %v877_v30 = vpop.f32.mrf.mxu1 }
 0x1de   : > { %v639_v32 = vsel %vm439_vm11, %v626_v29, 0.0  ;;  %v654_v33 = vmul.f32 %v626_v29, %v626_v29  ;;  %631 = vrot.lane.b32.xlu0 %v626_v29, %s912_s13 }
 0x1df   : > { %v640_v34 = vadd.f32 %v639_v32, %v638_v31 }
 0x1e0   : > { %v656_v36 = vsel %vm439_vm11, %v654_v33, 0.0 }
 0x1e1   : > { %v641_v37 = vrot.slane %v640_v34, 4  ;;  %v657_v38 = vadd.f32 %v656_v36, %v655_v35 }
 0x1e3   : > { %v642_v39 = vadd.f32 %v641_v37, %v640_v34  ;;  %v658_v40 = vrot.slane %v657_v38, 4 }
 0x1e5   : > { %v643_v41 = vrot.slane %v642_v39, 2  ;;  %v659_v42 = vadd.f32 %v658_v40, %v657_v38 }
 0x1e7   : > { %v644_v43 = vadd.f32 %v643_v41, %v642_v39  ;;  %v660_v44 = vrot.slane %v659_v42, 2 }
 0x1e9   : > { %v645_v45 = vrot.slane %v644_v43, 1  ;;  %v661_v46 = vadd.f32 %v660_v44, %v659_v42 }
 0x1eb   : > { %v646_v47 = vadd.f32 %v645_v45, %v644_v43  ;;  %v662_v48 = vrot.slane %v661_v46, 1 }
 0x1ed   : > { %648 = vrot.lane.b32.xlu1 %v646_v47, %s912_s13  ;;  %v663_v49 = vadd.f32 %v662_v48, %v661_v46 }
 0x1ef   : > { %665 = vrot.lane.b32.xlu0 %v663_v49, %s912_s13 }
 0x24c   : > { %v630_v50 = vpop.permute.xlu1 %629 }
 0x24d   : > { %636 = vst.msk [vmem:[%s1042_s15] sm:$0xff] %vm635_vm13, %v630_v50 }
 0x250   : > { %v632_v51 = vpop.permute.xlu0 %631 }
 0x251   : > { %637 = vst.msk [vmem:[%s1042_s15 + $0x8] sm:$0xff] %vm635_vm13, %v632_v51 }
 0x25f   : > { %v649_v52 = vpop.permute.xlu1 %648 }
 0x260   : > { %652 = vst.msk [vmem:[%s1056_s19] sm:$0x1] %vm651_vm14, %v649_v52 }
 0x261   : > { %v666_v53 = vpop.permute.xlu0 %665 }
 0x262   : > { %668 = vst.msk [vmem:[%s1056_s19 + $0x1] sm:$0x1] %vm651_vm14, %v666_v53 }
 0x263 PF: > { %s14_s12 = sadd.s32 1, %s906_s12  }
 0x264   : > { %p11_p4 = scmp.ge.s32.totalorder %s14_s12, 4  }
 0x266   :  { %13 = sbr.rel (!%p11_p4) target bundleno = 1 (0x1), region = 72 }

// kernel: basic_block_apply.4
= control target key start
LH: loop header
LB: loop body
LE: loop exit
PB: predicated region body
PF: predicated region fallthrough
CT: control target
= control target key end

     0   :  { %s1019_s18 = smov 0   ;;  %s1165_s0 = inlined_call_operand.vmem [shape: f32[2,16,64], index: 0, kind: input, shape index: {}]   ;;  %s1166_s1 = inlined_call_operand.vmem [shape: f32[1,64], index: 1, kind: input, shape index: {}]   ;;  %s1167_s2 = inlined_call_operand.vmem [shape: f32[1,64], index: 2, kind: input, shape index: {}]   ;;  %s1168_s3 = inlined_call_operand.vmem [shape: bf16[3,40,32], index: 3, kind: input, shape index: {}]   ;;  %s1169_s4 = inlined_call_operand.vmem [shape: f32[2,16,64], index: 4, kind: output, shape index: {0}]   ;;  %s1170_s5 = inlined_call_operand.vmem [shape: f32[2,2,64], index: 5, kind: output, shape index: {1}]  }
   0x1 LB: > { %s829_s19 = sadd.s32 4294967295, %s982_s18   ;;  %p833_p0 = scmp.ge.s32.totalorder %s982_s18, 1  ;;  %s982_s18 = sphi %s1019_s18, %s16_s18  }
   0x2   : > { %p190_p1 = scmp.lt.s32.totalorder %s982_s18, 3 }
   0x4   : > { %p191_p2 = pnand %p833_p0, %p190_p1 }
   0x5   : > { %p222_p3 = scmp.lt.s32.totalorder (!%p191_p2), %s829_s19, 1  ;;  %s986_s13 = smov (!%p191_p2), 4  }
   0x6   : > { %194 = sbr.rel (%p191_p2) target bundleno = 618 (0x26a), region = 36  ;;  %s987_s20 = smov (!%p191_p2), 96  }
   0xb   : > { %vm259_vm0 = vcmask 581632   ;;  %vm262_vm1 = vcmask 31744   ;;  %vm267_vm2 = vcmask 589344   ;;  %s1172_s19 = smov (!%p222_p3, %s829_s19), 1  ;;  %v839_v0 = vld [vmem:[%s1166_s1] ss:$0 sm:$0xff] }
   0xc   : > { %v984_v1 = vmov 0.0   ;;  %vm337_vm3 = vcmask 1043456   ;;  %v967_v2 = vld [vmem:[%s1168_s3 + $0x10] ss:$0 sps:$4 sm:$0xff]   ;;  %vm265_vm4 = vcmask 25600   ;;  %vm270_vm5 = vcmask 583200  }
   0xd   : > { %260 = vst.msk [vmem:[#allocation2] sm:$0x1] %vm259_vm0, %v984_v1  ;;  %261 = vst.msk [vmem:[#allocation2 + $0x11] sm:$0x1] %vm259_vm0, %v984_v1  ;;  %904 = vmatprep.subr.bf16.mxu1 %v984_v1  ;;  %894 = vmatprep.subr.bf16.mxu0 %v984_v1  ;;  %s868_s24 = sshll.u32 %s1172_s19, 4  ;;  %v1051_v4 = vsel %vm337_vm3, %v967_v2, 0 }
   0xe   : > { %264 = vst.msk [vmem:[#allocation2 + $0x8] sm:$0xff] %vm262_vm1, %v984_v1  ;;  %263 = vst.msk [vmem:[#allocation2] sm:$0xff] %vm262_vm1, %v984_v1  ;;  %v840_v3 = vld [vmem:[%s1167_s2] ss:$0 sm:$0xff]  ;;  %v1057_v5 = vld [vmem:[%s1168_s3 + $0x8] sm:$0xff]   ;;  %s226_s6 = scalar_lea.vmem %s1165_s0, %s868_s24  ;;  %905 = vmatpush3.bf16.msra.mxu1 %v1051_v4  ;;  %vm985_vm6 = vmmov 0   ;;  %s1136_s28 = scalar_lea.vmem %s1169_s4, %s868_s24 }
   0xf   : > { %269 = vst.msk [vmem:[#allocation2 + $0x8] sm:$0xff] %vm267_vm2, %v984_v1  ;;  %268 = vst.msk [vmem:[#allocation2] sm:$0xff] %vm267_vm2, %v984_v1  ;;  %v969_v6 = vld [vmem:[%s1168_s3 + $0x24] ss:$0 sps:$4 sm:$0xff]   ;;  %v238_v8 = vld [vmem:[%s226_s6 + $0x8] sm:$0xff]  ;;  %906 = vmatprep.subr.bf16.mxu1 %v984_v1  ;;  %910 = vmatprep.mubr.msk.bf16.mxu1 %vm985_vm6, %v984_v1  ;;  %vm280_vm7 = vcmask 556064  }
  0x10   : > { %266 = vst.msk [vmem:[#allocation2 + $0x10] sm:$0x3] %vm265_vm4, %v984_v1  ;;  %v237_v7 = vld [vmem:[%s226_s6] sm:$0xff]  ;;  %v247_v10 = vmul.f32 %v839_v0, %v238_v8  ;;  %v339_v11 = vsel %vm337_vm3, %v969_v6, 0  ;;  %900 = vmatprep.mubr.msk.bf16.mxu0 %vm985_vm6, %v984_v1  ;;  %v972_v18 = vld [vmem:[%s1168_s3 + $0x14] sm:$0xff]   ;;  %vm333_vm8 = vcmask 326656  }
  0x11   : > { %271 = vst.msk [vmem:[#allocation2 + $0x10] sm:$0x3] %vm270_vm5, %v984_v1  ;;  %v246_v9 = vmul.f32 %v839_v0, %v237_v7  ;;  %v1073_v12 = vld [vmem:[%s1168_s3] sm:$0xff]   ;;  %895 = vmatpush3.bf16.msra.mxu0 %v339_v11  ;;  %vm445_vm9 = vcmask 1046528   ;;  %v973_v36 = vld [vmem:[%s1168_s3 + $0x38] ss:$0 sps:$4 sm:$0xff]  }
  0x12   : > { %v971_v13 = vld [vmem:[%s1168_s3 + $0x1c] sm:$0xff]   ;;  %v256_v15 = vadd.f32 %v840_v3, %v247_v10  ;;  %907 = vmatpush3.bf16.msra.mxu1 %v1057_v5  ;;  %896 = vmatprep.subr.bf16.mxu0 %v984_v1  ;;  %vm305_vm10 = vsmask.f32 7424  ;;  %v468_v41 = vsel %vm337_vm3, %v973_v36, 0  ;;  %v974_v43 = vld [vmem:[%s1168_s3 + $0x30] sm:$0xff]   ;;  %v975_v44 = vld [vmem:[%s1168_s3 + $0x28] sm:$0xff]  }
  0x13   : > { %v255_v14 = vadd.f32 %v840_v3, %v246_v9  ;;  %908 = vmatprep.subr.bf16.mxu1 %v984_v1  ;;  %vm513_vm11 = vcmask 261120   ;;  %s838_s24 = sshll.u32 %s1172_s19, 1  ;;  %vm525_vm12 = vcmask 253952   ;;  %s988_s19 = smov 32   ;;  %vm709_vm13 = vcmask 523520  }
  0x14   : > { %v258_v17 = vmax.f32 %v256_v15, 0.0  ;;  %s1150_s6 = scalar_lea.vmem %s1170_s5, %s838_s24  ;;  %vm725_vm14 = vcmask 516352  }
  0x15   : > { %v257_v16 = vmax.f32 %v255_v14, 0.0  ;;  %897 = vmatpush3.bf16.msra.mxu0 %v971_v13 }
  0x16   : > { %909 = vmatpush3.bf16.msra.mxu1 %v1073_v12  ;;  %898 = vmatprep.subr.bf16.mxu0 %v984_v1 }
  0x17   : > { %274 = vrot.lane.b32.xlu0 %v257_v16, %s986_s13  ;;  %924 = vmatprep.subr.bf16.mxu1 %v984_v1 }
  0x19   : > { %899 = vmatpush3.bf16.msra.mxu0 %v972_v18 }
  0x1a   : > { %914 = vmatprep.subr.bf16.mxu0 %v984_v1 }
  0x1b   : > { %276 = vrot.lane.b32.xlu0 %v258_v17, %s986_s13 }
  0x89   : > { %v275_v19 = vpop.permute.xlu0 %274 }
  0x8a   : > { %281 = vst.msk [vmem:[#allocation2 + $0x1] sm:$0xff] %vm280_vm7, %v275_v19 }
  0x8d   : > { %v277_v20 = vpop.permute.xlu0 %276 }
  0x8e   : > { %282 = vst.msk [vmem:[#allocation2 + $0x9] sm:$0xff] %vm280_vm7, %v277_v20 }
  0x91   : > { %v300_v21 = vld [vmem:[#allocation2] sm:$0xff] }
  0x95   : > { %v301_v22 = vld [vmem:[#allocation2 + $0x8] sm:$0xff]  ;;  %v541_v23 = vld [vmem:[#allocation2 + $0x10] sm:$0x3] }
  0x96   : > { %v302_v24 = vld [vmem:[#allocation2 + $0x10] sm:$0x3]  ;;  %v303_v25 = vpack.c.bf16 %v301_v22, %v300_v21  ;;  %v543_v26 = vpack.c.bf16 %v541_v23, %v541_v23 }
  0x97   : > { %v304_v27 = vpack.c.bf16 %v302_v24, %v302_v24 }
  0x98   : > { %911 = vmatmul.mubr.msk.bf16.vlgmr.msra.gmra.mxu1 %vm333_vm8, %v303_v25  ;;  %v650_v28 = vrot.slane %v303_v25, 1  ;;  %v651_v29 = vrot.slane %v543_v26, 1  ;;  %v547_v30 = vshll.u32 %v303_v25, 16  ;;  %v552_v31 = vshll.u32 %v543_v26, 16 }
  0x99   : > { %v314_v32 = vshll.u32 %v304_v27, 16  ;;  %925 = vmatpush3.bf16.msra.mxu1 %v339_v11  ;;  %930 = vmatprep.mubr.msk.bf16.mxu1 %vm985_vm6, %v984_v1  ;;  %v545_v34 = vshrl.u32 %v303_v25, 16  ;;  %v447_v45 = vrot.slane %v304_v27, 1 }
  0x9a   : > { %v652_v33 = vsel %vm445_vm9, %v650_v28, %v651_v29  ;;  %v549_v35 = vrot.slane %v547_v30, 1  ;;  %926 = vmatprep.subr.bf16.mxu1 %v984_v1  ;;  %v554_v38 = vrot.slane %v552_v31, 1 }
  0x9b   : > { %653 = vrot.lane.b32.xlu0 %v652_v33, %s987_s20  ;;  %v316_v39 = vrot.slane %v314_v32, 1  ;;  %v448_v46 = vsel %vm445_vm9, %v650_v28, %v447_v45 }
  0x9c   : > { %v550_v37 = vor.u32 %v549_v35, %v545_v34 }
  0x9d   : > { %927 = vmatpush3.bf16.msra.mxu1 %v971_v13 }
  0x9e   : > { %v555_v40 = vsel %vm305_vm10, %v550_v37, %v554_v38  ;;  %928 = vmatprep.subr.bf16.mxu1 %v984_v1  ;;  %v317_v42 = vsel %vm305_vm10, %v550_v37, %v316_v39 }
  0x9f   : > { %556 = vrot.lane.b32.xlu1 %v555_v40, %s987_s20  ;;  %901 = vmatmul.mubr.msk.bf16.vlgmr.msra.gmra.mxu0 %vm333_vm8, %v317_v42 }
  0xa0   : > { %915 = vmatpush3.bf16.msra.mxu0 %v468_v41  ;;  %920 = vmatprep.mubr.msk.bf16.mxu0 %vm985_vm6, %v984_v1 }
  0xa1   : > { %916 = vmatprep.subr.bf16.mxu0 %v984_v1  ;;  %929 = vmatpush3.bf16.msra.mxu1 %v972_v18 }
  0xa2   : > { %944 = vmatprep.subr.bf16.mxu1 %v984_v1 }
  0xa3   : > { %603 = vrot.lane.b32.xlu1 %v303_v25, %s987_s20 }
  0xa4   : > { %917 = vmatpush3.bf16.msra.mxu0 %v974_v43 }
  0xa5   : > { %918 = vmatprep.subr.bf16.mxu0 %v984_v1 }
  0xa8   : > { %919 = vmatpush3.bf16.msra.mxu0 %v975_v44 }
  0xa9   : > { %934 = vmatprep.subr.bf16.mxu0 %v984_v1 }
  0xab   : > { %921 = vmatmul.mubr.msk.bf16.vlgmr.msra.gmra.mxu0 %vm333_vm8, %v448_v46 }
  0xac   : > { %935 = vmatpush3.bf16.msra.mxu0 %v1051_v4  ;;  %940 = vmatprep.mubr.msk.bf16.mxu0 %vm985_vm6, %v984_v1 }
  0xad   : > { %936 = vmatprep.subr.bf16.mxu0 %v984_v1 }
  0xb0   : > { %937 = vmatpush3.bf16.msra.mxu0 %v1057_v5 }
  0xb1   : > { %938 = vmatprep.subr.bf16.mxu0 %v984_v1 }
  0xb4   : > { %939 = vmatpush3.bf16.msra.mxu0 %v1073_v12 }
 0x10d   : > { %v654_v49 = vpop.permute.xlu0 %653 }
 0x111   : > { %v557_v47 = vpop.permute.xlu1 %556 }
 0x112   : > { %931 = vmatmul.mubr.msk.bf16.vlgmr.msra.gmra.mxu1 %vm333_vm8, %v557_v47 }
 0x113   : > { %945 = vmatpush3.bf16.msra.mxu1 %v468_v41  ;;  %950 = vmatprep.mubr.msk.bf16.mxu1 %vm985_vm6, %v984_v1 }
 0x114   : > { %946 = vmatprep.subr.bf16.mxu1 %v984_v1 }
 0x115   : > { %v604_v48 = vpop.permute.xlu1 %603 }
 0x116   : > { %941 = vmatmul.mubr.msk.bf16.vlgmr.msra.gmra.mxu0 %vm333_vm8, %v604_v48 }
 0x117   : > { %947 = vmatpush3.bf16.msra.mxu1 %v974_v43 }
 0x118   : > { %948 = vmatprep.subr.bf16.mxu1 %v984_v1 }
 0x11b   : > { %949 = vmatpush3.bf16.msra.mxu1 %v975_v44 }
 0x11e   : > { %951 = vmatmul.mubr.msk.bf16.vlgmr.msra.gmra.mxu1 %vm333_vm8, %v654_v49 }
 0x158   : > { %v436_v50 = vpop.f32.mrf.mxu1 }
 0x15a   : > { %v912_v51 = vpop.f32.mrf.mxu1 }
 0x15c   : > { %v439_v52 = vpop.f32.mrf.mxu1 }
 0x15e   : > { %v913_v53 = vpop.f32.mrf.mxu1 }
 0x15f   : > { %v375_v54 = vpop.f32.mrf.mxu0 }
 0x160   : > { %v437_v58 = vadd.f32 %v436_v50, %v375_v54 }
 0x161   : > { %v902_v55 = vpop.f32.mrf.mxu0 }
 0x163   : > { %v378_v56 = vpop.f32.mrf.mxu0 }
 0x164   : > { %v440_v62 = vadd.f32 %v439_v52, %v378_v56 }
 0x165   : > { %v903_v57 = vpop.f32.mrf.mxu0 }
 0x16b   : > { %v504_v59 = vpop.f32.mrf.mxu0 }
 0x16c   : > { %v511_v60 = vadd.f32 %v504_v59, %v437_v58 }
 0x16d   : > { %v922_v61 = vpop.f32.mrf.mxu0 }
 0x16e   : > { %514 = vst.msk [vmem:[%s1136_s28] sm:$0xff] %vm513_vm11, %v511_v60  ;;  %v527_v0 = vmul.f32 %v511_v60, %v511_v60  ;;  %v516_v3 = vsel %vm513_vm11, %v511_v60, 0.0 }
 0x16f   : > { %v507_v63 = vpop.f32.mrf.mxu0 }
 0x170   : > { %v512_v1 = vadd.f32 %v507_v63, %v440_v62  ;;  %v529_v7 = vsel %vm513_vm11, %v527_v0, 0.0 }
 0x171   : > { %v923_v2 = vpop.f32.mrf.mxu0 }
 0x172   : > { %515 = vst.msk [vmem:[%s1136_s28 + $0x8] sm:$0xff] %vm513_vm11, %v512_v1  ;;  %v517_v4 = vsel %vm513_vm11, %v512_v1, 0.0  ;;  %v528_v5 = vmul.f32 %v512_v1, %v512_v1 }
 0x173   : > { %v518_v6 = vadd.f32 %v517_v4, %v516_v3 }
 0x174   : > { %v530_v8 = vsel %vm513_vm11, %v528_v5, 0.0 }
 0x175   : > { %v519_v9 = vrot.slane %v518_v6, 4  ;;  %v531_v10 = vadd.f32 %v530_v8, %v529_v7 }
 0x177   : > { %v520_v11 = vadd.f32 %v519_v9, %v518_v6  ;;  %v532_v12 = vrot.slane %v531_v10, 4 }
 0x179   : > { %v521_v13 = vrot.slane %v520_v11, 2  ;;  %v533_v14 = vadd.f32 %v532_v12, %v531_v10 }
 0x17b   : > { %v522_v15 = vadd.f32 %v521_v13, %v520_v11  ;;  %v534_v16 = vrot.slane %v533_v14, 2 }
 0x17d   : > { %v523_v17 = vrot.slane %v522_v15, 1  ;;  %v535_v18 = vadd.f32 %v534_v16, %v533_v14 }
 0x17f   : > { %v524_v19 = vadd.f32 %v523_v17, %v522_v15  ;;  %v536_v20 = vrot.slane %v535_v18, 1 }
 0x181   : > { %526 = vst.msk [vmem:[%s1150_s6] sm:$0x1] %vm525_vm12, %v524_v19  ;;  %v537_v21 = vadd.f32 %v536_v20, %v535_v18 }
 0x183   : > { %538 = vst.msk [vmem:[%s1150_s6 + $0x1] sm:$0x1] %vm525_vm12, %v537_v21 }
 0x1d2   : > { %v595_v22 = vpop.f32.mrf.mxu1 }
 0x1d4   : > { %v932_v23 = vpop.f32.mrf.mxu1 }
 0x1d6   : > { %v598_v24 = vpop.f32.mrf.mxu1  ;;  %v642_v25 = vpop.f32.mrf.mxu0 }
 0x1d7   : > { %v643_v30 = vadd.f32 %v642_v25, %v595_v22 }
 0x1d8   : > { %v933_v26 = vpop.f32.mrf.mxu1  ;;  %v942_v27 = vpop.f32.mrf.mxu0 }
 0x1da   : > { %v645_v28 = vpop.f32.mrf.mxu0 }
 0x1db   : > { %v646_v34 = vadd.f32 %v645_v28, %v598_v24 }
 0x1dc   : > { %v943_v29 = vpop.f32.mrf.mxu0 }
 0x1de   : > { %v692_v31 = vpop.f32.mrf.mxu1 }
 0x1df   : > { %v699_v32 = vadd.f32 %v692_v31, %v643_v30 }
 0x1e0   : > { %v952_v33 = vpop.f32.mrf.mxu1 }
 0x1e1   : > { %703 = vrot.lane.b32.xlu1 %v699_v32, %s988_s19  ;;  %v727_v36 = vmul.f32 %v699_v32, %v699_v32  ;;  %v712_v39 = vsel %vm513_vm11, %v699_v32, 0.0 }
 0x1e2   : > { %v695_v35 = vpop.f32.mrf.mxu1 }
 0x1e3   : > { %v700_v37 = vadd.f32 %v695_v35, %v646_v34  ;;  %v729_v43 = vsel %vm513_vm11, %v727_v36, 0.0 }
 0x1e4   : > { %v953_v38 = vpop.f32.mrf.mxu1 }
 0x1e5   : > { %v713_v40 = vsel %vm513_vm11, %v700_v37, 0.0  ;;  %v728_v41 = vmul.f32 %v700_v37, %v700_v37  ;;  %705 = vrot.lane.b32.xlu0 %v700_v37, %s988_s19 }
 0x1e6   : > { %v714_v42 = vadd.f32 %v713_v40, %v712_v39 }
 0x1e7   : > { %v730_v44 = vsel %vm513_vm11, %v728_v41, 0.0 }
 0x1e8   : > { %v715_v45 = vrot.slane %v714_v42, 4  ;;  %v731_v46 = vadd.f32 %v730_v44, %v729_v43 }
 0x1ea   : > { %v716_v47 = vadd.f32 %v715_v45, %v714_v42  ;;  %v732_v48 = vrot.slane %v731_v46, 4 }
 0x1ec   : > { %v717_v49 = vrot.slane %v716_v47, 2  ;;  %v733_v50 = vadd.f32 %v732_v48, %v731_v46 }
 0x1ee   : > { %v718_v51 = vadd.f32 %v717_v49, %v716_v47  ;;  %v734_v52 = vrot.slane %v733_v50, 2 }
 0x1f0   : > { %v719_v53 = vrot.slane %v718_v51, 1  ;;  %v735_v54 = vadd.f32 %v734_v52, %v733_v50 }
 0x1f2   : > { %v720_v55 = vadd.f32 %v719_v53, %v718_v51  ;;  %v736_v56 = vrot.slane %v735_v54, 1 }
 0x1f4   : > { %722 = vrot.lane.b32.xlu1 %v720_v55, %s988_s19  ;;  %v737_v57 = vadd.f32 %v736_v56, %v735_v54 }
 0x1f6   : > { %739 = vrot.lane.b32.xlu0 %v737_v57, %s988_s19 }
 0x253   : > { %v704_v58 = vpop.permute.xlu1 %703 }
 0x254   : > { %710 = vst.msk [vmem:[%s1136_s28] sm:$0xff] %vm709_vm13, %v704_v58 }
 0x257   : > { %v706_v59 = vpop.permute.xlu0 %705 }
 0x258   : > { %711 = vst.msk [vmem:[%s1136_s28 + $0x8] sm:$0xff] %vm709_vm13, %v706_v59 }
 0x266   : > { %v723_v60 = vpop.permute.xlu1 %722 }
 0x267   : > { %726 = vst.msk [vmem:[%s1150_s6] sm:$0x1] %vm725_vm14, %v723_v60 }
 0x268   : > { %v740_v61 = vpop.permute.xlu0 %739 }
 0x269   : > { %742 = vst.msk [vmem:[%s1150_s6 + $0x1] sm:$0x1] %vm725_vm14, %v740_v61 }
 0x26a PF: > { %s16_s18 = sadd.s32 1, %s982_s18  }
 0x26b   : > { %p13_p4 = scmp.ge.s32.totalorder %s16_s18, 4  }
 0x26d   :  { %15 = sbr.rel (!%p13_p4) target bundleno = 1 (0x1), region = 80 }

</bundles_post_ra>
